<compile_context>
chip_gen: v7x
topology: tpu7x:2x2x1
jax: 0.10.0
libtpu: 0.0.40
codegen_flags: <defaults>
</compile_context>

<pallas_src>
import functools

import jax
import jax.numpy as jnp
import numpy as np
from jax.experimental import pallas as pl
from jax.experimental.pallas import tpu as pltpu

K = 16          # Conv1d kernel_size
STRIDE = 2      # Conv1d stride
EPS = 1e-5      # BatchNorm1d eps
NUM_CONVS = 3
PSZ = K + 3     # per-stage params: [w0..w15, conv_bias, bn_gamma, bn_beta]


def hhead_kernel(x_ref, p_ref, o_ref, *, num_convs, eps):
    """All (conv s2 -> BN(train) -> tanh -> f) blocks fused, evaluated a-trous.

    x_ref : (N, L)                 VMEM  -- raw input (channel squeezed)
    p_ref : (num_convs*(K+3),)     SMEM  -- flat per-stage [w0..w15, bias, gamma, beta]
    o_ref : (N, L_dense_final)     VMEM  -- dense carrier; true outputs at stride 2**3
    """
    h = x_ref[...]                      # dense carrier, f32
    n = h.shape[0]
    l_true = h.shape[1]                 # number of true samples encoded in h
    dil = 1                             # spacing of true samples inside h

    for s in range(num_convs):
        base = s * PSZ
        l_dense_in = h.shape[1]
        l_true_out = (l_true - K) // STRIDE + 1          # true output length
        l_dense_out = l_dense_in - (K - 1) * dil          # dense (a-trous) output length
        dil_out = dil * STRIDE

        # ---- Conv1d(1,1,16,stride=2) as a dilation-`dil` conv on the dense carrier.
        # Taps are contiguous lane slices.  Conv bias is omitted: it is exactly
        # cancelled by the training-mode BatchNorm mean subtraction below.
        # 4 partial accumulators break the 16-deep serial VALU add chain.
        accs = [p_ref[base + t] * h[:, t * dil: t * dil + l_dense_out] for t in range(4)]
        for t in range(4, K):
            accs[t % 4] = accs[t % 4] + p_ref[base + t] * h[:, t * dil: t * dil + l_dense_out]
        c = (accs[0] + accs[1]) + (accs[2] + accs[3])

        # ---- BatchNorm1d(1), training mode: batch stats over the TRUE elements only
        # (dense positions that are multiples of dil_out, within the true range).
        pos = jax.lax.broadcasted_iota(jnp.int32, (n, l_dense_out), 1)
        valid = (pos % dil_out == 0) & (pos <= dil_out * (l_true_out - 1))
        cnt = float(n * l_true_out)
        mean = jnp.sum(jnp.where(valid, c, 0.0), keepdims=True) / cnt
        var = jnp.sum(jnp.where(valid, (c - mean) ** 2, 0.0), keepdims=True) / cnt
        y = (c - mean) * jax.lax.rsqrt(var + eps)
        y = y * p_ref[base + K + 1] + p_ref[base + K + 2]   # gamma, beta

        # ---- Tanh + f (applied densely; garbage positions stay finite and only ever
        # feed other garbage positions, never the true ones).
        y = jnp.tanh(y)
        h = jnp.where(y < -1e-11, y * (-1e10), y)

        l_true = l_true_out
        dil = dil_out

    o_ref[...] = h                       # dense final carrier; wrapper decimates once


def _dense_geometry(l):
    """Final (dense_len, true_len, dilation) after NUM_CONVS a-trous stages."""
    dense, true_l, dil = l, l, 1
    for _ in range(NUM_CONVS):
        dense = dense - (K - 1) * dil
        true_l = (true_l - K) // STRIDE + 1
        dil *= STRIDE
    return dense, true_l, dil


@jax.jit
def hhead_forward(x, params_flat):
    """x: (N, 1, L) f32, params_flat: (NUM_CONVS*(K+3),) f32 -> (N, 1, L_final) f32."""
    n, c, l = x.shape
    assert c == 1, "hHead's Conv1d has in_channels = 1"
    dense_f, true_f, dil_f = _dense_geometry(l)
    assert true_f >= 1 and dense_f >= 1, "input length too short for 3 conv stages"

    kern = functools.partial(hhead_kernel, num_convs=NUM_CONVS, eps=EPS)
    out_dense = pl.pallas_call(
        kern,
        out_shape=jax.ShapeDtypeStruct((n, dense_f), jnp.float32),
        in_specs=[
            pl.BlockSpec(memory_space=pltpu.MemorySpace.VMEM),   # x (whole array)
            pl.BlockSpec(memory_space=pltpu.MemorySpace.SMEM),   # flat params (scalars)
        ],
        out_specs=pl.BlockSpec(memory_space=pltpu.MemorySpace.VMEM),
    )(x[:, 0, :], params_flat)

    # Extract the true outputs (dense positions 0, dil_f, 2*dil_f, ...).
    out = out_dense[:, : dil_f * (true_f - 1) + 1: dil_f]
    return out[:, None, :]


# ---------------- pure-JAX reference (for a sanity check) ----------------
def ref_forward(x, params_list):
    for p in params_list:
        w = p[:K].reshape(1, 1, K)
        b = p[K]
        gamma, beta = p[K + 1], p[K + 2]
        y = jax.lax.conv_general_dilated(
            x, w, window_strides=(STRIDE,), padding="VALID",
            dimension_numbers=("NCH", "OIH", "NCH")) + b
        mean = jnp.mean(y)
        var = jnp.mean((y - mean) ** 2)
        y = (y - mean) * jax.lax.rsqrt(var + EPS) * gamma + beta
        y = jnp.tanh(y)
        x = jnp.where(y < -1e-11, y * (-1e10), y)
    return x


if __name__ == "__main__":
    key = jax.random.PRNGKey(0)

    # Deterministic parameter init (PyTorch Conv1d default: U(-1/sqrt(C_in*K), +...),
    # BatchNorm1d default: gamma=1, beta=0).
    params_list = []
    bound = 1.0 / np.sqrt(1 * K)
    for _ in range(NUM_CONVS):
        key, kw, kb = jax.random.split(key, 3)
        w = jax.random.uniform(kw, (K,), jnp.float32, -bound, bound)
        b = jax.random.uniform(kb, (1,), jnp.float32, -bound, bound)
        gamma = jnp.ones((1,), jnp.float32)
        beta = jnp.zeros((1,), jnp.float32)
        params_list.append(jnp.concatenate([w, b, gamma, beta]))
    params_flat = jnp.concatenate(params_list)

    key, kx = jax.random.split(key)
    x = jax.random.normal(kx, (2, 1, 256), jnp.float32)   # (batch, channels=1, length)

    out = jax.block_until_ready(hhead_forward(x, params_flat))
    ref = jax.block_until_ready(ref_forward(x, params_list))

    # length: 256 -> 121 -> 53 -> 19
    assert out.shape == ref.shape == (2, 1, 19), out.shape
    assert bool(jnp.allclose(out, ref, rtol=1e-3, atol=1e-4)), "mismatch vs reference"
    print("KERNEL_OK")
</pallas_src>

<mosaic_0001>
module attributes {stable_mosaic.version = 11 : i64} {
  func.func @hhead_kernel(%arg0: memref<2x256xf32, #tpu.memory_space<vmem>>, %arg1: memref<57xf32, #tpu.memory_space<smem>>, %arg2: memref<2x151xf32, #tpu.memory_space<vmem>>) attributes {dimension_semantics = [], scalar_prefetch = 0 : i64, scratch_operands = 0 : i64, tpu.core_type = #tpu.core_type<tc>} {
    %c0 = arith.constant 0 : index
    %c0_0 = arith.constant 0 : index
    %0 = vector.load %arg0[%c0, %c0_0] : memref<2x256xf32, #tpu.memory_space<vmem>>, vector<2x256xf32>
    %c0_1 = arith.constant 0 : index
    %1 = memref.load %arg1[%c0_1] : memref<57xf32, #tpu.memory_space<smem>>
    %2 = vector.extract_strided_slice %0 {offsets = [0, 0], sizes = [2, 241], strides = [1, 1]} : vector<2x256xf32> to vector<2x241xf32>
    %3 = vector.broadcast %1 : f32 to vector<2x241xf32>
    %4 = arith.mulf %3, %2 : vector<2x241xf32>
    %c1 = arith.constant 1 : index
    %5 = memref.load %arg1[%c1] : memref<57xf32, #tpu.memory_space<smem>>
    %6 = vector.extract_strided_slice %0 {offsets = [0, 1], sizes = [2, 241], strides = [1, 1]} : vector<2x256xf32> to vector<2x241xf32>
    %7 = vector.broadcast %5 : f32 to vector<2x241xf32>
    %8 = arith.mulf %7, %6 : vector<2x241xf32>
    %c2 = arith.constant 2 : index
    %9 = memref.load %arg1[%c2] : memref<57xf32, #tpu.memory_space<smem>>
    %10 = vector.extract_strided_slice %0 {offsets = [0, 2], sizes = [2, 241], strides = [1, 1]} : vector<2x256xf32> to vector<2x241xf32>
    %11 = vector.broadcast %9 : f32 to vector<2x241xf32>
    %12 = arith.mulf %11, %10 : vector<2x241xf32>
    %c3 = arith.constant 3 : index
    %13 = memref.load %arg1[%c3] : memref<57xf32, #tpu.memory_space<smem>>
    %14 = vector.extract_strided_slice %0 {offsets = [0, 3], sizes = [2, 241], strides = [1, 1]} : vector<2x256xf32> to vector<2x241xf32>
    %15 = vector.broadcast %13 : f32 to vector<2x241xf32>
    %16 = arith.mulf %15, %14 : vector<2x241xf32>
    %c4 = arith.constant 4 : index
    %17 = memref.load %arg1[%c4] : memref<57xf32, #tpu.memory_space<smem>>
    %18 = vector.extract_strided_slice %0 {offsets = [0, 4], sizes = [2, 241], strides = [1, 1]} : vector<2x256xf32> to vector<2x241xf32>
    %19 = vector.broadcast %17 : f32 to vector<2x241xf32>
    %20 = arith.mulf %19, %18 : vector<2x241xf32>
    %21 = arith.addf %4, %20 : vector<2x241xf32>
    %c5 = arith.constant 5 : index
    %22 = memref.load %arg1[%c5] : memref<57xf32, #tpu.memory_space<smem>>
    %23 = vector.extract_strided_slice %0 {offsets = [0, 5], sizes = [2, 241], strides = [1, 1]} : vector<2x256xf32> to vector<2x241xf32>
    %24 = vector.broadcast %22 : f32 to vector<2x241xf32>
    %25 = arith.mulf %24, %23 : vector<2x241xf32>
    %26 = arith.addf %8, %25 : vector<2x241xf32>
    %c6 = arith.constant 6 : index
    %27 = memref.load %arg1[%c6] : memref<57xf32, #tpu.memory_space<smem>>
    %28 = vector.extract_strided_slice %0 {offsets = [0, 6], sizes = [2, 241], strides = [1, 1]} : vector<2x256xf32> to vector<2x241xf32>
    %29 = vector.broadcast %27 : f32 to vector<2x241xf32>
    %30 = arith.mulf %29, %28 : vector<2x241xf32>
    %31 = arith.addf %12, %30 : vector<2x241xf32>
    %c7 = arith.constant 7 : index
    %32 = memref.load %arg1[%c7] : memref<57xf32, #tpu.memory_space<smem>>
    %33 = vector.extract_strided_slice %0 {offsets = [0, 7], sizes = [2, 241], strides = [1, 1]} : vector<2x256xf32> to vector<2x241xf32>
    %34 = vector.broadcast %32 : f32 to vector<2x241xf32>
    %35 = arith.mulf %34, %33 : vector<2x241xf32>
    %36 = arith.addf %16, %35 : vector<2x241xf32>
    %c8 = arith.constant 8 : index
    %37 = memref.load %arg1[%c8] : memref<57xf32, #tpu.memory_space<smem>>
    %38 = vector.extract_strided_slice %0 {offsets = [0, 8], sizes = [2, 241], strides = [1, 1]} : vector<2x256xf32> to vector<2x241xf32>
    %39 = vector.broadcast %37 : f32 to vector<2x241xf32>
    %40 = arith.mulf %39, %38 : vector<2x241xf32>
    %41 = arith.addf %21, %40 : vector<2x241xf32>
    %c9 = arith.constant 9 : index
    %42 = memref.load %arg1[%c9] : memref<57xf32, #tpu.memory_space<smem>>
    %43 = vector.extract_strided_slice %0 {offsets = [0, 9], sizes = [2, 241], strides = [1, 1]} : vector<2x256xf32> to vector<2x241xf32>
    %44 = vector.broadcast %42 : f32 to vector<2x241xf32>
    %45 = arith.mulf %44, %43 : vector<2x241xf32>
    %46 = arith.addf %26, %45 : vector<2x241xf32>
    %c10 = arith.constant 10 : index
    %47 = memref.load %arg1[%c10] : memref<57xf32, #tpu.memory_space<smem>>
    %48 = vector.extract_strided_slice %0 {offsets = [0, 10], sizes = [2, 241], strides = [1, 1]} : vector<2x256xf32> to vector<2x241xf32>
    %49 = vector.broadcast %47 : f32 to vector<2x241xf32>
    %50 = arith.mulf %49, %48 : vector<2x241xf32>
    %51 = arith.addf %31, %50 : vector<2x241xf32>
    %c11 = arith.constant 11 : index
    %52 = memref.load %arg1[%c11] : memref<57xf32, #tpu.memory_space<smem>>
    %53 = vector.extract_strided_slice %0 {offsets = [0, 11], sizes = [2, 241], strides = [1, 1]} : vector<2x256xf32> to vector<2x241xf32>
    %54 = vector.broadcast %52 : f32 to vector<2x241xf32>
    %55 = arith.mulf %54, %53 : vector<2x241xf32>
    %56 = arith.addf %36, %55 : vector<2x241xf32>
    %c12 = arith.constant 12 : index
    %57 = memref.load %arg1[%c12] : memref<57xf32, #tpu.memory_space<smem>>
    %58 = vector.extract_strided_slice %0 {offsets = [0, 12], sizes = [2, 241], strides = [1, 1]} : vector<2x256xf32> to vector<2x241xf32>
    %59 = vector.broadcast %57 : f32 to vector<2x241xf32>
    %60 = arith.mulf %59, %58 : vector<2x241xf32>
    %61 = arith.addf %41, %60 : vector<2x241xf32>
    %c13 = arith.constant 13 : index
    %62 = memref.load %arg1[%c13] : memref<57xf32, #tpu.memory_space<smem>>
    %63 = vector.extract_strided_slice %0 {offsets = [0, 13], sizes = [2, 241], strides = [1, 1]} : vector<2x256xf32> to vector<2x241xf32>
    %64 = vector.broadcast %62 : f32 to vector<2x241xf32>
    %65 = arith.mulf %64, %63 : vector<2x241xf32>
    %66 = arith.addf %46, %65 : vector<2x241xf32>
    %c14 = arith.constant 14 : index
    %67 = memref.load %arg1[%c14] : memref<57xf32, #tpu.memory_space<smem>>
    %68 = vector.extract_strided_slice %0 {offsets = [0, 14], sizes = [2, 241], strides = [1, 1]} : vector<2x256xf32> to vector<2x241xf32>
    %69 = vector.broadcast %67 : f32 to vector<2x241xf32>
    %70 = arith.mulf %69, %68 : vector<2x241xf32>
    %71 = arith.addf %51, %70 : vector<2x241xf32>
    %c15 = arith.constant 15 : index
    %72 = memref.load %arg1[%c15] : memref<57xf32, #tpu.memory_space<smem>>
    %73 = vector.extract_strided_slice %0 {offsets = [0, 15], sizes = [2, 241], strides = [1, 1]} : vector<2x256xf32> to vector<2x241xf32>
    %74 = vector.broadcast %72 : f32 to vector<2x241xf32>
    %75 = arith.mulf %74, %73 : vector<2x241xf32>
    %76 = arith.addf %56, %75 : vector<2x241xf32>
    %77 = arith.addf %61, %66 : vector<2x241xf32>
    %78 = arith.addf %71, %76 : vector<2x241xf32>
    %79 = arith.addf %77, %78 : vector<2x241xf32>
    %80 = tpu.iota {dimensions = array<i32: 1>} : vector<2x241xi32>
    %c2_i32 = arith.constant 2 : i32
    %c0_i32 = arith.constant 0 : i32
    %81 = arith.cmpi eq, %c2_i32, %c0_i32 : i32
    %c1_i32 = arith.constant 1 : i32
    %82 = arith.select %81, %c1_i32, %c2_i32 : i32
    %83 = vector.broadcast %82 : i32 to vector<2x241xi32>
    %84 = arith.remsi %80, %83 : vector<2x241xi32>
    %c0_i32_2 = arith.constant 0 : i32
    %85 = vector.broadcast %c0_i32_2 : i32 to vector<2x241xi32>
    %86 = arith.cmpi ne, %84, %85 : vector<2x241xi32>
    %c0_i32_3 = arith.constant 0 : i32
    %87 = vector.broadcast %c0_i32_3 : i32 to vector<2x241xi32>
    %88 = arith.cmpi slt, %84, %87 : vector<2x241xi32>
    %c0_i32_4 = arith.constant 0 : i32
    %89 = arith.cmpi slt, %82, %c0_i32_4 : i32
    %90 = vector.broadcast %89 : i1 to vector<2x241xi1>
    %91 = vector.broadcast %90 : vector<2x241xi1> to vector<2x241xi1>
    %92 = arith.xori %88, %91 : vector<2x241xi1>
    %93 = arith.andi %92, %86 : vector<2x241xi1>
    %94 = vector.broadcast %82 : i32 to vector<2x241xi32>
    %95 = arith.addi %84, %94 : vector<2x241xi32>
    %96 = arith.select %93, %95, %84 : vector<2x241xi1>, vector<2x241xi32>
    %c0_i32_5 = arith.constant 0 : i32
    %97 = vector.broadcast %c0_i32_5 : i32 to vector<2x241xi32>
    %98 = arith.cmpi eq, %96, %97 : vector<2x241xi32>
    %c240_i32 = arith.constant 240 : i32
    %99 = vector.broadcast %c240_i32 : i32 to vector<2x241xi32>
    %100 = arith.cmpi sle, %80, %99 : vector<2x241xi32>
    %101 = arith.andi %98, %100 : vector<2x241xi1>
    %cst = arith.constant 0.000000e+00 : f32
    %102 = vector.broadcast %cst : f32 to vector<2x241xf32>
    %103 = arith.select %101, %79, %102 : vector<2x241xi1>, vector<2x241xf32>
    %104 = vector.shape_cast %103 : vector<2x241xf32> to vector<1x2x241xf32>
    %cst_6 = arith.constant dense<0.000000e+00> : vector<1xf32>
    %105 = vector.multi_reduction <add>, %104, %cst_6 [1, 2] : vector<1x2x241xf32> to vector<1xf32>
    %106 = vector.shape_cast %105 : vector<1xf32> to vector<1x1x1xf32>
    %107 = vector.extract %106[0, 0, 0] : f32 from vector<1x1x1xf32>
    %108 = vector.broadcast %107 : f32 to vector<1x1xf32>
    %cst_7 = arith.constant 2.420000e+02 : f32
    %109 = vector.broadcast %cst_7 : f32 to vector<1x1xf32>
    %110 = arith.divf %108, %109 : vector<1x1xf32>
    %111 = vector.broadcast %110 : vector<1x1xf32> to vector<2x241xf32>
    %112 = arith.subf %79, %111 : vector<2x241xf32>
    %113 = arith.mulf %112, %112 : vector<2x241xf32>
    %cst_8 = arith.constant 0.000000e+00 : f32
    %114 = vector.broadcast %cst_8 : f32 to vector<2x241xf32>
    %115 = arith.select %101, %113, %114 : vector<2x241xi1>, vector<2x241xf32>
    %116 = vector.shape_cast %115 : vector<2x241xf32> to vector<1x2x241xf32>
    %cst_9 = arith.constant dense<0.000000e+00> : vector<1xf32>
    %117 = vector.multi_reduction <add>, %116, %cst_9 [1, 2] : vector<1x2x241xf32> to vector<1xf32>
    %118 = vector.shape_cast %117 : vector<1xf32> to vector<1x1x1xf32>
    %119 = vector.extract %118[0, 0, 0] : f32 from vector<1x1x1xf32>
    %120 = vector.broadcast %119 : f32 to vector<1x1xf32>
    %cst_10 = arith.constant 2.420000e+02 : f32
    %121 = vector.broadcast %cst_10 : f32 to vector<1x1xf32>
    %122 = arith.divf %120, %121 : vector<1x1xf32>
    %123 = vector.broadcast %110 : vector<1x1xf32> to vector<2x241xf32>
    %124 = arith.subf %79, %123 : vector<2x241xf32>
    %cst_11 = arith.constant 9.99999974E-6 : f32
    %125 = vector.broadcast %cst_11 : f32 to vector<1x1xf32>
    %126 = arith.addf %122, %125 : vector<1x1xf32>
    %127 = math.rsqrt %126 : vector<1x1xf32>
    %128 = vector.broadcast %127 : vector<1x1xf32> to vector<2x241xf32>
    %129 = arith.mulf %124, %128 : vector<2x241xf32>
    %c17 = arith.constant 17 : index
    %130 = memref.load %arg1[%c17] : memref<57xf32, #tpu.memory_space<smem>>
    %131 = vector.broadcast %130 : f32 to vector<2x241xf32>
    %132 = arith.mulf %129, %131 : vector<2x241xf32>
    %c18 = arith.constant 18 : index
    %133 = memref.load %arg1[%c18] : memref<57xf32, #tpu.memory_space<smem>>
    %134 = vector.broadcast %133 : f32 to vector<2x241xf32>
    %135 = arith.addf %132, %134 : vector<2x241xf32>
    %136 = math.tanh %135 : vector<2x241xf32>
    %cst_12 = arith.constant -9.99999996E-12 : f32
    %137 = vector.broadcast %cst_12 : f32 to vector<2x241xf32>
    %138 = arith.cmpf olt, %136, %137 : vector<2x241xf32>
    %cst_13 = arith.constant -1.000000e+10 : f32
    %139 = vector.broadcast %cst_13 : f32 to vector<2x241xf32>
    %140 = arith.mulf %136, %139 : vector<2x241xf32>
    %141 = arith.select %138, %140, %136 : vector<2x241xi1>, vector<2x241xf32>
    %c19 = arith.constant 19 : index
    %142 = memref.load %arg1[%c19] : memref<57xf32, #tpu.memory_space<smem>>
    %143 = vector.extract_strided_slice %141 {offsets = [0, 0], sizes = [2, 211], strides = [1, 1]} : vector<2x241xf32> to vector<2x211xf32>
    %144 = vector.broadcast %142 : f32 to vector<2x211xf32>
    %145 = arith.mulf %144, %143 : vector<2x211xf32>
    %c20 = arith.constant 20 : index
    %146 = memref.load %arg1[%c20] : memref<57xf32, #tpu.memory_space<smem>>
    %147 = vector.extract_strided_slice %141 {offsets = [0, 2], sizes = [2, 211], strides = [1, 1]} : vector<2x241xf32> to vector<2x211xf32>
    %148 = vector.broadcast %146 : f32 to vector<2x211xf32>
    %149 = arith.mulf %148, %147 : vector<2x211xf32>
    %c21 = arith.constant 21 : index
    %150 = memref.load %arg1[%c21] : memref<57xf32, #tpu.memory_space<smem>>
    %151 = vector.extract_strided_slice %141 {offsets = [0, 4], sizes = [2, 211], strides = [1, 1]} : vector<2x241xf32> to vector<2x211xf32>
    %152 = vector.broadcast %150 : f32 to vector<2x211xf32>
    %153 = arith.mulf %152, %151 : vector<2x211xf32>
    %c22 = arith.constant 22 : index
    %154 = memref.load %arg1[%c22] : memref<57xf32, #tpu.memory_space<smem>>
    %155 = vector.extract_strided_slice %141 {offsets = [0, 6], sizes = [2, 211], strides = [1, 1]} : vector<2x241xf32> to vector<2x211xf32>
    %156 = vector.broadcast %154 : f32 to vector<2x211xf32>
    %157 = arith.mulf %156, %155 : vector<2x211xf32>
    %c23 = arith.constant 23 : index
    %158 = memref.load %arg1[%c23] : memref<57xf32, #tpu.memory_space<smem>>
    %159 = vector.extract_strided_slice %141 {offsets = [0, 8], sizes = [2, 211], strides = [1, 1]} : vector<2x241xf32> to vector<2x211xf32>
    %160 = vector.broadcast %158 : f32 to vector<2x211xf32>
    %161 = arith.mulf %160, %159 : vector<2x211xf32>
    %162 = arith.addf %145, %161 : vector<2x211xf32>
    %c24 = arith.constant 24 : index
    %163 = memref.load %arg1[%c24] : memref<57xf32, #tpu.memory_space<smem>>
    %164 = vector.extract_strided_slice %141 {offsets = [0, 10], sizes = [2, 211], strides = [1, 1]} : vector<2x241xf32> to vector<2x211xf32>
    %165 = vector.broadcast %163 : f32 to vector<2x211xf32>
    %166 = arith.mulf %165, %164 : vector<2x211xf32>
    %167 = arith.addf %149, %166 : vector<2x211xf32>
    %c25 = arith.constant 25 : index
    %168 = memref.load %arg1[%c25] : memref<57xf32, #tpu.memory_space<smem>>
    %169 = vector.extract_strided_slice %141 {offsets = [0, 12], sizes = [2, 211], strides = [1, 1]} : vector<2x241xf32> to vector<2x211xf32>
    %170 = vector.broadcast %168 : f32 to vector<2x211xf32>
    %171 = arith.mulf %170, %169 : vector<2x211xf32>
    %172 = arith.addf %153, %171 : vector<2x211xf32>
    %c26 = arith.constant 26 : index
    %173 = memref.load %arg1[%c26] : memref<57xf32, #tpu.memory_space<smem>>
    %174 = vector.extract_strided_slice %141 {offsets = [0, 14], sizes = [2, 211], strides = [1, 1]} : vector<2x241xf32> to vector<2x211xf32>
    %175 = vector.broadcast %173 : f32 to vector<2x211xf32>
    %176 = arith.mulf %175, %174 : vector<2x211xf32>
    %177 = arith.addf %157, %176 : vector<2x211xf32>
    %c27 = arith.constant 27 : index
    %178 = memref.load %arg1[%c27] : memref<57xf32, #tpu.memory_space<smem>>
    %179 = vector.extract_strided_slice %141 {offsets = [0, 16], sizes = [2, 211], strides = [1, 1]} : vector<2x241xf32> to vector<2x211xf32>
    %180 = vector.broadcast %178 : f32 to vector<2x211xf32>
    %181 = arith.mulf %180, %179 : vector<2x211xf32>
    %182 = arith.addf %162, %181 : vector<2x211xf32>
    %c28 = arith.constant 28 : index
    %183 = memref.load %arg1[%c28] : memref<57xf32, #tpu.memory_space<smem>>
    %184 = vector.extract_strided_slice %141 {offsets = [0, 18], sizes = [2, 211], strides = [1, 1]} : vector<2x241xf32> to vector<2x211xf32>
    %185 = vector.broadcast %183 : f32 to vector<2x211xf32>
    %186 = arith.mulf %185, %184 : vector<2x211xf32>
    %187 = arith.addf %167, %186 : vector<2x211xf32>
    %c29 = arith.constant 29 : index
    %188 = memref.load %arg1[%c29] : memref<57xf32, #tpu.memory_space<smem>>
    %189 = vector.extract_strided_slice %141 {offsets = [0, 20], sizes = [2, 211], strides = [1, 1]} : vector<2x241xf32> to vector<2x211xf32>
    %190 = vector.broadcast %188 : f32 to vector<2x211xf32>
    %191 = arith.mulf %190, %189 : vector<2x211xf32>
    %192 = arith.addf %172, %191 : vector<2x211xf32>
    %c30 = arith.constant 30 : index
    %193 = memref.load %arg1[%c30] : memref<57xf32, #tpu.memory_space<smem>>
    %194 = vector.extract_strided_slice %141 {offsets = [0, 22], sizes = [2, 211], strides = [1, 1]} : vector<2x241xf32> to vector<2x211xf32>
    %195 = vector.broadcast %193 : f32 to vector<2x211xf32>
    %196 = arith.mulf %195, %194 : vector<2x211xf32>
    %197 = arith.addf %177, %196 : vector<2x211xf32>
    %c31 = arith.constant 31 : index
    %198 = memref.load %arg1[%c31] : memref<57xf32, #tpu.memory_space<smem>>
    %199 = vector.extract_strided_slice %141 {offsets = [0, 24], sizes = [2, 211], strides = [1, 1]} : vector<2x241xf32> to vector<2x211xf32>
    %200 = vector.broadcast %198 : f32 to vector<2x211xf32>
    %201 = arith.mulf %200, %199 : vector<2x211xf32>
    %202 = arith.addf %182, %201 : vector<2x211xf32>
    %c32 = arith.constant 32 : index
    %203 = memref.load %arg1[%c32] : memref<57xf32, #tpu.memory_space<smem>>
    %204 = vector.extract_strided_slice %141 {offsets = [0, 26], sizes = [2, 211], strides = [1, 1]} : vector<2x241xf32> to vector<2x211xf32>
    %205 = vector.broadcast %203 : f32 to vector<2x211xf32>
    %206 = arith.mulf %205, %204 : vector<2x211xf32>
    %207 = arith.addf %187, %206 : vector<2x211xf32>
    %c33 = arith.constant 33 : index
    %208 = memref.load %arg1[%c33] : memref<57xf32, #tpu.memory_space<smem>>
    %209 = vector.extract_strided_slice %141 {offsets = [0, 28], sizes = [2, 211], strides = [1, 1]} : vector<2x241xf32> to vector<2x211xf32>
    %210 = vector.broadcast %208 : f32 to vector<2x211xf32>
    %211 = arith.mulf %210, %209 : vector<2x211xf32>
    %212 = arith.addf %192, %211 : vector<2x211xf32>
    %c34 = arith.constant 34 : index
    %213 = memref.load %arg1[%c34] : memref<57xf32, #tpu.memory_space<smem>>
    %214 = vector.extract_strided_slice %141 {offsets = [0, 30], sizes = [2, 211], strides = [1, 1]} : vector<2x241xf32> to vector<2x211xf32>
    %215 = vector.broadcast %213 : f32 to vector<2x211xf32>
    %216 = arith.mulf %215, %214 : vector<2x211xf32>
    %217 = arith.addf %197, %216 : vector<2x211xf32>
    %218 = arith.addf %202, %207 : vector<2x211xf32>
    %219 = arith.addf %212, %217 : vector<2x211xf32>
    %220 = arith.addf %218, %219 : vector<2x211xf32>
    %221 = tpu.iota {dimensions = array<i32: 1>} : vector<2x211xi32>
    %c4_i32 = arith.constant 4 : i32
    %c0_i32_14 = arith.constant 0 : i32
    %222 = arith.cmpi eq, %c4_i32, %c0_i32_14 : i32
    %c1_i32_15 = arith.constant 1 : i32
    %223 = arith.select %222, %c1_i32_15, %c4_i32 : i32
    %224 = vector.broadcast %223 : i32 to vector<2x211xi32>
    %225 = arith.remsi %221, %224 : vector<2x211xi32>
    %c0_i32_16 = arith.constant 0 : i32
    %226 = vector.broadcast %c0_i32_16 : i32 to vector<2x211xi32>
    %227 = arith.cmpi ne, %225, %226 : vector<2x211xi32>
    %c0_i32_17 = arith.constant 0 : i32
    %228 = vector.broadcast %c0_i32_17 : i32 to vector<2x211xi32>
    %229 = arith.cmpi slt, %225, %228 : vector<2x211xi32>
    %c0_i32_18 = arith.constant 0 : i32
    %230 = arith.cmpi slt, %223, %c0_i32_18 : i32
    %231 = vector.broadcast %230 : i1 to vector<2x211xi1>
    %232 = vector.broadcast %231 : vector<2x211xi1> to vector<2x211xi1>
    %233 = arith.xori %229, %232 : vector<2x211xi1>
    %234 = arith.andi %233, %227 : vector<2x211xi1>
    %235 = vector.broadcast %223 : i32 to vector<2x211xi32>
    %236 = arith.addi %225, %235 : vector<2x211xi32>
    %237 = arith.select %234, %236, %225 : vector<2x211xi1>, vector<2x211xi32>
    %c0_i32_19 = arith.constant 0 : i32
    %238 = vector.broadcast %c0_i32_19 : i32 to vector<2x211xi32>
    %239 = arith.cmpi eq, %237, %238 : vector<2x211xi32>
    %c208_i32 = arith.constant 208 : i32
    %240 = vector.broadcast %c208_i32 : i32 to vector<2x211xi32>
    %241 = arith.cmpi sle, %221, %240 : vector<2x211xi32>
    %242 = arith.andi %239, %241 : vector<2x211xi1>
    %cst_20 = arith.constant 0.000000e+00 : f32
    %243 = vector.broadcast %cst_20 : f32 to vector<2x211xf32>
    %244 = arith.select %242, %220, %243 : vector<2x211xi1>, vector<2x211xf32>
    %245 = vector.shape_cast %244 : vector<2x211xf32> to vector<1x2x211xf32>
    %cst_21 = arith.constant dense<0.000000e+00> : vector<1xf32>
    %246 = vector.multi_reduction <add>, %245, %cst_21 [1, 2] : vector<1x2x211xf32> to vector<1xf32>
    %247 = vector.shape_cast %246 : vector<1xf32> to vector<1x1x1xf32>
    %248 = vector.extract %247[0, 0, 0] : f32 from vector<1x1x1xf32>
    %249 = vector.broadcast %248 : f32 to vector<1x1xf32>
    %cst_22 = arith.constant 1.060000e+02 : f32
    %250 = vector.broadcast %cst_22 : f32 to vector<1x1xf32>
    %251 = arith.divf %249, %250 : vector<1x1xf32>
    %252 = vector.broadcast %251 : vector<1x1xf32> to vector<2x211xf32>
    %253 = arith.subf %220, %252 : vector<2x211xf32>
    %254 = arith.mulf %253, %253 : vector<2x211xf32>
    %cst_23 = arith.constant 0.000000e+00 : f32
    %255 = vector.broadcast %cst_23 : f32 to vector<2x211xf32>
    %256 = arith.select %242, %254, %255 : vector<2x211xi1>, vector<2x211xf32>
    %257 = vector.shape_cast %256 : vector<2x211xf32> to vector<1x2x211xf32>
    %cst_24 = arith.constant dense<0.000000e+00> : vector<1xf32>
    %258 = vector.multi_reduction <add>, %257, %cst_24 [1, 2] : vector<1x2x211xf32> to vector<1xf32>
    %259 = vector.shape_cast %258 : vector<1xf32> to vector<1x1x1xf32>
    %260 = vector.extract %259[0, 0, 0] : f32 from vector<1x1x1xf32>
    %261 = vector.broadcast %260 : f32 to vector<1x1xf32>
    %cst_25 = arith.constant 1.060000e+02 : f32
    %262 = vector.broadcast %cst_25 : f32 to vector<1x1xf32>
    %263 = arith.divf %261, %262 : vector<1x1xf32>
    %264 = vector.broadcast %251 : vector<1x1xf32> to vector<2x211xf32>
    %265 = arith.subf %220, %264 : vector<2x211xf32>
    %cst_26 = arith.constant 9.99999974E-6 : f32
    %266 = vector.broadcast %cst_26 : f32 to vector<1x1xf32>
    %267 = arith.addf %263, %266 : vector<1x1xf32>
    %268 = math.rsqrt %267 : vector<1x1xf32>
    %269 = vector.broadcast %268 : vector<1x1xf32> to vector<2x211xf32>
    %270 = arith.mulf %265, %269 : vector<2x211xf32>
    %c36 = arith.constant 36 : index
    %271 = memref.load %arg1[%c36] : memref<57xf32, #tpu.memory_space<smem>>
    %272 = vector.broadcast %271 : f32 to vector<2x211xf32>
    %273 = arith.mulf %270, %272 : vector<2x211xf32>
    %c37 = arith.constant 37 : index
    %274 = memref.load %arg1[%c37] : memref<57xf32, #tpu.memory_space<smem>>
    %275 = vector.broadcast %274 : f32 to vector<2x211xf32>
    %276 = arith.addf %273, %275 : vector<2x211xf32>
    %277 = math.tanh %276 : vector<2x211xf32>
    %cst_27 = arith.constant -9.99999996E-12 : f32
    %278 = vector.broadcast %cst_27 : f32 to vector<2x211xf32>
    %279 = arith.cmpf olt, %277, %278 : vector<2x211xf32>
    %cst_28 = arith.constant -1.000000e+10 : f32
    %280 = vector.broadcast %cst_28 : f32 to vector<2x211xf32>
    %281 = arith.mulf %277, %280 : vector<2x211xf32>
    %282 = arith.select %279, %281, %277 : vector<2x211xi1>, vector<2x211xf32>
    %c38 = arith.constant 38 : index
    %283 = memref.load %arg1[%c38] : memref<57xf32, #tpu.memory_space<smem>>
    %284 = vector.extract_strided_slice %282 {offsets = [0, 0], sizes = [2, 151], strides = [1, 1]} : vector<2x211xf32> to vector<2x151xf32>
    %285 = vector.broadcast %283 : f32 to vector<2x151xf32>
    %286 = arith.mulf %285, %284 : vector<2x151xf32>
    %c39 = arith.constant 39 : index
    %287 = memref.load %arg1[%c39] : memref<57xf32, #tpu.memory_space<smem>>
    %288 = vector.extract_strided_slice %282 {offsets = [0, 4], sizes = [2, 151], strides = [1, 1]} : vector<2x211xf32> to vector<2x151xf32>
    %289 = vector.broadcast %287 : f32 to vector<2x151xf32>
    %290 = arith.mulf %289, %288 : vector<2x151xf32>
    %c40 = arith.constant 40 : index
    %291 = memref.load %arg1[%c40] : memref<57xf32, #tpu.memory_space<smem>>
    %292 = vector.extract_strided_slice %282 {offsets = [0, 8], sizes = [2, 151], strides = [1, 1]} : vector<2x211xf32> to vector<2x151xf32>
    %293 = vector.broadcast %291 : f32 to vector<2x151xf32>
    %294 = arith.mulf %293, %292 : vector<2x151xf32>
    %c41 = arith.constant 41 : index
    %295 = memref.load %arg1[%c41] : memref<57xf32, #tpu.memory_space<smem>>
    %296 = vector.extract_strided_slice %282 {offsets = [0, 12], sizes = [2, 151], strides = [1, 1]} : vector<2x211xf32> to vector<2x151xf32>
    %297 = vector.broadcast %295 : f32 to vector<2x151xf32>
    %298 = arith.mulf %297, %296 : vector<2x151xf32>
    %c42 = arith.constant 42 : index
    %299 = memref.load %arg1[%c42] : memref<57xf32, #tpu.memory_space<smem>>
    %300 = vector.extract_strided_slice %282 {offsets = [0, 16], sizes = [2, 151], strides = [1, 1]} : vector<2x211xf32> to vector<2x151xf32>
    %301 = vector.broadcast %299 : f32 to vector<2x151xf32>
    %302 = arith.mulf %301, %300 : vector<2x151xf32>
    %303 = arith.addf %286, %302 : vector<2x151xf32>
    %c43 = arith.constant 43 : index
    %304 = memref.load %arg1[%c43] : memref<57xf32, #tpu.memory_space<smem>>
    %305 = vector.extract_strided_slice %282 {offsets = [0, 20], sizes = [2, 151], strides = [1, 1]} : vector<2x211xf32> to vector<2x151xf32>
    %306 = vector.broadcast %304 : f32 to vector<2x151xf32>
    %307 = arith.mulf %306, %305 : vector<2x151xf32>
    %308 = arith.addf %290, %307 : vector<2x151xf32>
    %c44 = arith.constant 44 : index
    %309 = memref.load %arg1[%c44] : memref<57xf32, #tpu.memory_space<smem>>
    %310 = vector.extract_strided_slice %282 {offsets = [0, 24], sizes = [2, 151], strides = [1, 1]} : vector<2x211xf32> to vector<2x151xf32>
    %311 = vector.broadcast %309 : f32 to vector<2x151xf32>
    %312 = arith.mulf %311, %310 : vector<2x151xf32>
    %313 = arith.addf %294, %312 : vector<2x151xf32>
    %c45 = arith.constant 45 : index
    %314 = memref.load %arg1[%c45] : memref<57xf32, #tpu.memory_space<smem>>
    %315 = vector.extract_strided_slice %282 {offsets = [0, 28], sizes = [2, 151], strides = [1, 1]} : vector<2x211xf32> to vector<2x151xf32>
    %316 = vector.broadcast %314 : f32 to vector<2x151xf32>
    %317 = arith.mulf %316, %315 : vector<2x151xf32>
    %318 = arith.addf %298, %317 : vector<2x151xf32>
    %c46 = arith.constant 46 : index
    %319 = memref.load %arg1[%c46] : memref<57xf32, #tpu.memory_space<smem>>
    %320 = vector.extract_strided_slice %282 {offsets = [0, 32], sizes = [2, 151], strides = [1, 1]} : vector<2x211xf32> to vector<2x151xf32>
    %321 = vector.broadcast %319 : f32 to vector<2x151xf32>
    %322 = arith.mulf %321, %320 : vector<2x151xf32>
    %323 = arith.addf %303, %322 : vector<2x151xf32>
    %c47 = arith.constant 47 : index
    %324 = memref.load %arg1[%c47] : memref<57xf32, #tpu.memory_space<smem>>
    %325 = vector.extract_strided_slice %282 {offsets = [0, 36], sizes = [2, 151], strides = [1, 1]} : vector<2x211xf32> to vector<2x151xf32>
    %326 = vector.broadcast %324 : f32 to vector<2x151xf32>
    %327 = arith.mulf %326, %325 : vector<2x151xf32>
    %328 = arith.addf %308, %327 : vector<2x151xf32>
    %c48 = arith.constant 48 : index
    %329 = memref.load %arg1[%c48] : memref<57xf32, #tpu.memory_space<smem>>
    %330 = vector.extract_strided_slice %282 {offsets = [0, 40], sizes = [2, 151], strides = [1, 1]} : vector<2x211xf32> to vector<2x151xf32>
    %331 = vector.broadcast %329 : f32 to vector<2x151xf32>
    %332 = arith.mulf %331, %330 : vector<2x151xf32>
    %333 = arith.addf %313, %332 : vector<2x151xf32>
    %c49 = arith.constant 49 : index
    %334 = memref.load %arg1[%c49] : memref<57xf32, #tpu.memory_space<smem>>
    %335 = vector.extract_strided_slice %282 {offsets = [0, 44], sizes = [2, 151], strides = [1, 1]} : vector<2x211xf32> to vector<2x151xf32>
    %336 = vector.broadcast %334 : f32 to vector<2x151xf32>
    %337 = arith.mulf %336, %335 : vector<2x151xf32>
    %338 = arith.addf %318, %337 : vector<2x151xf32>
    %c50 = arith.constant 50 : index
    %339 = memref.load %arg1[%c50] : memref<57xf32, #tpu.memory_space<smem>>
    %340 = vector.extract_strided_slice %282 {offsets = [0, 48], sizes = [2, 151], strides = [1, 1]} : vector<2x211xf32> to vector<2x151xf32>
    %341 = vector.broadcast %339 : f32 to vector<2x151xf32>
    %342 = arith.mulf %341, %340 : vector<2x151xf32>
    %343 = arith.addf %323, %342 : vector<2x151xf32>
    %c51 = arith.constant 51 : index
    %344 = memref.load %arg1[%c51] : memref<57xf32, #tpu.memory_space<smem>>
    %345 = vector.extract_strided_slice %282 {offsets = [0, 52], sizes = [2, 151], strides = [1, 1]} : vector<2x211xf32> to vector<2x151xf32>
    %346 = vector.broadcast %344 : f32 to vector<2x151xf32>
    %347 = arith.mulf %346, %345 : vector<2x151xf32>
    %348 = arith.addf %328, %347 : vector<2x151xf32>
    %c52 = arith.constant 52 : index
    %349 = memref.load %arg1[%c52] : memref<57xf32, #tpu.memory_space<smem>>
    %350 = vector.extract_strided_slice %282 {offsets = [0, 56], sizes = [2, 151], strides = [1, 1]} : vector<2x211xf32> to vector<2x151xf32>
    %351 = vector.broadcast %349 : f32 to vector<2x151xf32>
    %352 = arith.mulf %351, %350 : vector<2x151xf32>
    %353 = arith.addf %333, %352 : vector<2x151xf32>
    %c53 = arith.constant 53 : index
    %354 = memref.load %arg1[%c53] : memref<57xf32, #tpu.memory_space<smem>>
    %355 = vector.extract_strided_slice %282 {offsets = [0, 60], sizes = [2, 151], strides = [1, 1]} : vector<2x211xf32> to vector<2x151xf32>
    %356 = vector.broadcast %354 : f32 to vector<2x151xf32>
    %357 = arith.mulf %356, %355 : vector<2x151xf32>
    %358 = arith.addf %338, %357 : vector<2x151xf32>
    %359 = arith.addf %343, %348 : vector<2x151xf32>
    %360 = arith.addf %353, %358 : vector<2x151xf32>
    %361 = arith.addf %359, %360 : vector<2x151xf32>
    %362 = tpu.iota {dimensions = array<i32: 1>} : vector<2x151xi32>
    %c8_i32 = arith.constant 8 : i32
    %c0_i32_29 = arith.constant 0 : i32
    %363 = arith.cmpi eq, %c8_i32, %c0_i32_29 : i32
    %c1_i32_30 = arith.constant 1 : i32
    %364 = arith.select %363, %c1_i32_30, %c8_i32 : i32
    %365 = vector.broadcast %364 : i32 to vector<2x151xi32>
    %366 = arith.remsi %362, %365 : vector<2x151xi32>
    %c0_i32_31 = arith.constant 0 : i32
    %367 = vector.broadcast %c0_i32_31 : i32 to vector<2x151xi32>
    %368 = arith.cmpi ne, %366, %367 : vector<2x151xi32>
    %c0_i32_32 = arith.constant 0 : i32
    %369 = vector.broadcast %c0_i32_32 : i32 to vector<2x151xi32>
    %370 = arith.cmpi slt, %366, %369 : vector<2x151xi32>
    %c0_i32_33 = arith.constant 0 : i32
    %371 = arith.cmpi slt, %364, %c0_i32_33 : i32
    %372 = vector.broadcast %371 : i1 to vector<2x151xi1>
    %373 = vector.broadcast %372 : vector<2x151xi1> to vector<2x151xi1>
    %374 = arith.xori %370, %373 : vector<2x151xi1>
    %375 = arith.andi %374, %368 : vector<2x151xi1>
    %376 = vector.broadcast %364 : i32 to vector<2x151xi32>
    %377 = arith.addi %366, %376 : vector<2x151xi32>
    %378 = arith.select %375, %377, %366 : vector<2x151xi1>, vector<2x151xi32>
    %c0_i32_34 = arith.constant 0 : i32
    %379 = vector.broadcast %c0_i32_34 : i32 to vector<2x151xi32>
    %380 = arith.cmpi eq, %378, %379 : vector<2x151xi32>
    %c144_i32 = arith.constant 144 : i32
    %381 = vector.broadcast %c144_i32 : i32 to vector<2x151xi32>
    %382 = arith.cmpi sle, %362, %381 : vector<2x151xi32>
    %383 = arith.andi %380, %382 : vector<2x151xi1>
    %cst_35 = arith.constant 0.000000e+00 : f32
    %384 = vector.broadcast %cst_35 : f32 to vector<2x151xf32>
    %385 = arith.select %383, %361, %384 : vector<2x151xi1>, vector<2x151xf32>
    %386 = vector.shape_cast %385 : vector<2x151xf32> to vector<1x2x151xf32>
    %cst_36 = arith.constant dense<0.000000e+00> : vector<1xf32>
    %387 = vector.multi_reduction <add>, %386, %cst_36 [1, 2] : vector<1x2x151xf32> to vector<1xf32>
    %388 = vector.shape_cast %387 : vector<1xf32> to vector<1x1x1xf32>
    %389 = vector.extract %388[0, 0, 0] : f32 from vector<1x1x1xf32>
    %390 = vector.broadcast %389 : f32 to vector<1x1xf32>
    %cst_37 = arith.constant 3.800000e+01 : f32
    %391 = vector.broadcast %cst_37 : f32 to vector<1x1xf32>
    %392 = arith.divf %390, %391 : vector<1x1xf32>
    %393 = vector.broadcast %392 : vector<1x1xf32> to vector<2x151xf32>
    %394 = arith.subf %361, %393 : vector<2x151xf32>
    %395 = arith.mulf %394, %394 : vector<2x151xf32>
    %cst_38 = arith.constant 0.000000e+00 : f32
    %396 = vector.broadcast %cst_38 : f32 to vector<2x151xf32>
    %397 = arith.select %383, %395, %396 : vector<2x151xi1>, vector<2x151xf32>
    %398 = vector.shape_cast %397 : vector<2x151xf32> to vector<1x2x151xf32>
    %cst_39 = arith.constant dense<0.000000e+00> : vector<1xf32>
    %399 = vector.multi_reduction <add>, %398, %cst_39 [1, 2] : vector<1x2x151xf32> to vector<1xf32>
    %400 = vector.shape_cast %399 : vector<1xf32> to vector<1x1x1xf32>
    %401 = vector.extract %400[0, 0, 0] : f32 from vector<1x1x1xf32>
    %402 = vector.broadcast %401 : f32 to vector<1x1xf32>
    %cst_40 = arith.constant 3.800000e+01 : f32
    %403 = vector.broadcast %cst_40 : f32 to vector<1x1xf32>
    %404 = arith.divf %402, %403 : vector<1x1xf32>
    %405 = vector.broadcast %392 : vector<1x1xf32> to vector<2x151xf32>
    %406 = arith.subf %361, %405 : vector<2x151xf32>
    %cst_41 = arith.constant 9.99999974E-6 : f32
    %407 = vector.broadcast %cst_41 : f32 to vector<1x1xf32>
    %408 = arith.addf %404, %407 : vector<1x1xf32>
    %409 = math.rsqrt %408 : vector<1x1xf32>
    %410 = vector.broadcast %409 : vector<1x1xf32> to vector<2x151xf32>
    %411 = arith.mulf %406, %410 : vector<2x151xf32>
    %c55 = arith.constant 55 : index
    %412 = memref.load %arg1[%c55] : memref<57xf32, #tpu.memory_space<smem>>
    %413 = vector.broadcast %412 : f32 to vector<2x151xf32>
    %414 = arith.mulf %411, %413 : vector<2x151xf32>
    %c56 = arith.constant 56 : index
    %415 = memref.load %arg1[%c56] : memref<57xf32, #tpu.memory_space<smem>>
    %416 = vector.broadcast %415 : f32 to vector<2x151xf32>
    %417 = arith.addf %414, %416 : vector<2x151xf32>
    %418 = math.tanh %417 : vector<2x151xf32>
    %cst_42 = arith.constant -9.99999996E-12 : f32
    %419 = vector.broadcast %cst_42 : f32 to vector<2x151xf32>
    %420 = arith.cmpf olt, %418, %419 : vector<2x151xf32>
    %cst_43 = arith.constant -1.000000e+10 : f32
    %421 = vector.broadcast %cst_43 : f32 to vector<2x151xf32>
    %422 = arith.mulf %418, %421 : vector<2x151xf32>
    %423 = arith.select %420, %422, %418 : vector<2x151xi1>, vector<2x151xf32>
    %c0_44 = arith.constant 0 : index
    %c0_45 = arith.constant 0 : index
    %424 = vector.load %arg2[%c0_44, %c0_45] : memref<2x151xf32, #tpu.memory_space<vmem>>, vector<2x151xf32>
    tpu.vector_store %arg2[%c0_44, %c0_45], %423 {strides = array<i32>} : memref<2x151xf32, #tpu.memory_space<vmem>>, vector<2x151xf32>,
    return
  }
}

</mosaic_0001>

<bundles_post_ra>
// kernel: hhead_forward.1
= control target key start
LH: loop header
LB: loop body
LE: loop exit
PB: predicated region body
PF: predicated region fallthrough
CT: control target
= control target key end

     0   :  { %7 = vsyncpa [#allocation3], 0  ;;  %s1158_s0 = inlined_call_operand.vmem [shape: f32[2,256], index: 0, kind: input, shape index: {}]   ;;  %s1159_s1 = inlined_call_operand.vmem [shape: f32[57], index: 1, kind: input, shape index: {}]   ;;  %s1160_s2 = inlined_call_operand.vmem [shape: f32[2,151], index: 2, kind: output, shape index: {}]  }
   0x1   :  { %s16_s11 = sshll.u32 %s1159_s1, 4  ;;  %s17_s11 = int_to_ptr.vmem [resolvable:$true] %s16_s11 }
   0x2   :  { %s896_s12 = scalar_lea.vmem %s17_s11, 16  ;;  %p901_p1 = scmp.lt.s32.totalorder %s17_s11, %s17_s11 }
   0x3   :  { %p897_p0 = scmp.ne.s32.totalorder %s17_s11, %s896_s12  ;;  %p902_p2 = scmp.lt.s32.totalorder %s896_s12, %s896_s12 }
   0x5   :  { %p903_p3 = por %p902_p2, %p901_p1 }
   0x7   :  { %p904_p4 = pnand %p903_p3, %p897_p0 }
   0x9   :  { %907 = shalt.err (!%p904_p4)
}
   0xa   :  { %s910_s13 = smov [#allocation2]  }
   0xb   :  { %19 = dma.vmem_to_smem %s17_s11, 16, %s910_s13, [#allocation3]  }
   0xc   :  { %908 = dma.done.wait [#allocation3], 16  }
   0xd   :  { %909 = vsyncadd [#allocation3], 4294967280 }
   0xe   :  { %23 = sfence }
   0xf   :  { %s814_s14 = sld [smem:[#allocation2 + $0x7]]  ;;  %s818_s16 = sld [smem:[#allocation2 + $0xb]]  ;;  %v942_v0 = vld [vmem:[%s1158_s0] sm:$0xf]  ;;  %vm44_vm0 = vcmask 1014784   ;;  %vm85_vm1 = vcmask 982016  }
  0x10   :  { %s822_s15 = sld [smem:[#allocation2 + $0xf]]  ;;  %s812_s17 = sld [smem:[#allocation2 + $0x5]]  ;;  %vm126_vm2 = vcmask 949248   ;;  %vm164_vm3 = vcmask 1039360   ;;  %vm179_vm4 = vcmask 1031168   ;;  %vm229_vm9 = vcmask 1041408  }
  0x11   :  { %s813_s18 = sld [smem:[#allocation2 + $0x6]]  ;;  %s816_s20 = sld [smem:[#allocation2 + $0x9]]  ;;  %vm231_vm10 = vcmask 918528   ;;  %vm347_vm12 = vcmask 916480   ;;  %vm388_vm13 = vcmask 850944  }
  0x12   :  { %s817_s21 = sld [smem:[#allocation2 + $0xa]]  ;;  %s820_s22 = sld [smem:[#allocation2 + $0xd]] }
  0x13   :  { %s911_s23 = smov 124   ;;  %s912_s24 = smov 116  }
  0x14   :  { %s821_s0 = sld [smem:[#allocation2 + $0xe]]  ;;  %s913_s25 = smov 120  }
  0x15   :  { %v69_v1 = vstv %s814_s14  ;;  %v110_v5 = vstv %s818_s16  ;;  %s811_s26 = sld [smem:[#allocation2 + $0x4]]  ;;  %s810_s28 = sld [smem:[#allocation2 + $0x3]] }
  0x16   :  { %v70_v2 = vmul.f32 %v69_v1, %v942_v0  ;;  %v151_v3 = vstv %s822_s15  ;;  %v111_v6 = vmul.f32 %v110_v5, %v942_v0  ;;  %v49_v7 = vstv %s812_s17  ;;  %s819_s27 = sld [smem:[#allocation2 + $0xc]]  ;;  %s808_s29 = sld [smem:[#allocation2 + $0x1]] }
  0x17   :  { %v152_v4 = vmul.f32 %v151_v3, %v942_v0  ;;  %v50_v8 = vmul.f32 %v49_v7, %v942_v0  ;;  %v59_v9 = vstv %s813_s18  ;;  %v90_v10 = vstv %s816_s20  ;;  %s815_s30 = sld [smem:[#allocation2 + $0x8]]  ;;  %s914_s3 = smov 127  }
  0x18   :  { %72 = vrot.lane.b32.xlu0 %v70_v2, %s911_s23  ;;  %v60_v11 = vmul.f32 %v59_v9, %v942_v0  ;;  %v91_v12 = vmul.f32 %v90_v10, %v942_v0  ;;  %v100_v13 = vstv %s817_s21  ;;  %v131_v14 = vstv %s820_s22  ;;  %s809_s4 = sld [smem:[#allocation2 + $0x2]]  ;;  %s25_s5 = sld [smem:[#allocation2]] }
  0x19   :  { %154 = vrot.lane.b32.xlu1 %v152_v4, %s912_s24  ;;  %v101_v15 = vmul.f32 %v100_v13, %v942_v0  ;;  %v132_v16 = vmul.f32 %v131_v14, %v942_v0  ;;  %s915_s6 = smov 126   ;;  %s823_s9 = sld [smem:[#allocation2 + $0x11]] }
  0x1a   :  { %v141_v17 = vstv %s821_s0  ;;  %s824_s10 = sld [smem:[#allocation2 + $0x12]]  ;;  %s836_s11 = sld [smem:[#allocation2 + $0x1e]] }
  0x1b   :  { %v142_v18 = vmul.f32 %v141_v17, %v942_v0  ;;  %v38_v19 = vstv %s811_s26  ;;  %v35_v23 = vstv %s810_s28  ;;  %s832_s12 = sld [smem:[#allocation2 + $0x1a]]  ;;  %s830_s14 = sld [smem:[#allocation2 + $0x18]] }
  0x1c   :  { %113 = vrot.lane.b32.xlu0 %v111_v6, %s913_s25  ;;  %v39_v20 = vmul.f32 %v38_v19, %v942_v0  ;;  %v120_v21 = vstv %s819_s27  ;;  %v36_v27 = vmul.f32 %v35_v23, %v942_v0  ;;  %v29_v28 = vstv %s808_s29  ;;  %s840_s13 = sld [smem:[#allocation2 + $0x22]]  ;;  %s831_s15 = sld [smem:[#allocation2 + $0x19]] }
  0x1d   :  { %52 = vrot.lane.b32.xlu1 %v50_v8, %s911_s23  ;;  %v121_v22 = vmul.f32 %v120_v21, %v942_v0  ;;  %v30_v34 = vmul.f32 %v29_v28, %v942_v0  ;;  %v79_v43 = vstv %s815_s30  ;;  %s834_s16 = sld [smem:[#allocation2 + $0x1c]]  ;;  %s835_s17 = sld [smem:[#allocation2 + $0x1d]] }
  0x1e   :  { %v80_v47 = vmul.f32 %v79_v43, %v942_v0  ;;  %v32_v55 = vstv %s809_s4  ;;  %v26_v2 = vstv %s25_s5  ;;  %s838_s18 = sld [smem:[#allocation2 + $0x20]]  ;;  %s917_s19 = smov 112  }
  0x1f   :  { %v33_v57 = vmul.f32 %v32_v55, %v942_v0  ;;  %v27_v7 = vmul.f32 %v26_v2, %v942_v0  ;;  %s839_s1 = sld [smem:[#allocation2 + $0x21]]  ;;  %s918_s20 = smov 104  }
  0x20   :  { %62 = vrot.lane.b32.xlu0 %v60_v11, %s911_s23  ;;  %s829_s21 = sld [smem:[#allocation2 + $0x17]]  ;;  %s826_s0 = sld [smem:[#allocation2 + $0x14]] }
  0x21   :  { %93 = vrot.lane.b32.xlu1 %v91_v12, %s913_s25  ;;  %s837_s22 = sld [smem:[#allocation2 + $0x1f]]  ;;  %s833_s26 = sld [smem:[#allocation2 + $0x1b]] }
  0x22   :  { %s827_s27 = sld [smem:[#allocation2 + $0x15]]  ;;  %s825_s28 = sld [smem:[#allocation2 + $0x13]] }
  0x23   :  { %s842_s4 = sld [smem:[#allocation2 + $0x25]]  ;;  %s854_s5 = sld [smem:[#allocation2 + $0x31]] }
  0x24   :  { %103 = vrot.lane.b32.xlu0 %v101_v15, %s913_s25 }
  0x25   :  { %134 = vrot.lane.b32.xlu1 %v132_v16, %s912_s24 }
  0x28   :  { %144 = vrot.lane.b32.xlu0 %v142_v18, %s912_s24 }
  0x2c   :  { %41 = vrot.lane.b32.xlu0 %v39_v20, %s911_s23 }
  0x30   :  { %123 = vrot.lane.b32.xlu0 %v121_v22, %s912_s24  ;;  %s828_s24 = sld [smem:[#allocation2 + $0x16]] }
  0x8a   :  { %v73_v24 = vpop.permute.xlu0 %72 }
  0x8b   :  { %v74_v25 = vrot.slane %v73_v24, 2  ;;  %v155_v26 = vpop.permute.xlu1 %154 }
  0x8c   :  { %v156_v31 = vrot.slane %v155_v26, 2 }
  0x8d   :  { %v75_v29 = vsel %vm44_vm0, %v73_v24, %v74_v25  ;;  %v183_v25 = vlaneseq }
  0x8e   :  { %v114_v30 = vpop.permute.xlu0 %113  ;;  %v77_v35 = vadd.f32 %v75_v29, %v36_v27  ;;  %v157_v40 = vsel %vm126_vm2, %v155_v26, %v156_v31  ;;  %v916_v27 = vmov 1983009808  }
  0x8f   :  { %v115_v32 = vrot.slane %v114_v30, 2  ;;  %v53_v33 = vpop.permute.xlu1 %52  ;;  %v983_v26 = vand.u32 127, %v183_v25  ;;  %v218_v28 = vunpack.c.l.s4 %v916_v27  ;;  %v221_v31 = vshrl.u32 %v183_v25, 7 }
  0x90   :  { %v54_v36 = vrot.slane %v53_v33, 2  ;;  %v413_v25 = vstv %s840_s13  ;;  %v311_v27 = vstv %s830_s14  ;;  %s919_s13 = smov 96   ;;  %s857_s14 = sld [smem:[#allocation2 + $0x34]] }
  0x91   :  { %v116_v37 = vsel %vm85_vm1, %v114_v30, %v115_v32  ;;  %v986_v29 = vadd.s32 128, %v983_v26  ;;  %v219_v30 = vunpack.c.0.s8 %v218_v28 }
  0x92   :  { %v118_v38 = vadd.f32 %v116_v37, %v77_v35  ;;  %v55_v39 = vsel %vm44_vm0, %v53_v33, %v54_v36  ;;  %v63_v53 = vpop.permute.xlu0 %62  ;;  %v190_v35 = vand.u32 1, %v983_v26 }
  0x93   :  { %v57_v41 = vadd.f32 %v55_v39, %v30_v34  ;;  %v94_v42 = vpop.permute.xlu1 %93  ;;  %v64_v56 = vrot.slane %v63_v53, 2  ;;  %v197_v33 = vand.u32 1, %v986_v29  ;;  %v990_v36 = vsub.s32 %v219_v30, %v221_v31 }
  0x94   :  { %v159_v44 = vadd.f32 %v157_v40, %v118_v38  ;;  %v95_v45 = vrot.slane %v94_v42, 2  ;;  %vm213_vm6 = vcmp.le.s32.totalorder %v986_v29, 240  ;;  %vm994_vm7 = vcmp.eq.s32.totalorder %v190_v35, 0 }
  0x95   :  { %v65_v59 = vsel %vm44_vm0, %v63_v53, %v64_v56  ;;  %vm211_vm5 = vcmp.eq.s32.totalorder %v197_v33, 0  ;;  %v321_v31 = vstv %s831_s15  ;;  %v362_v35 = vstv %s835_s17  ;;  %s920_s15 = smov 80   ;;  %s855_s17 = sld [smem:[#allocation2 + $0x32]] }
  0x96   :  { %169 = vrot.lane.b32.xlu1 %v159_v44, %s914_s3  ;;  %v96_v46 = vsel %vm85_vm1, %v94_v42, %v95_v45  ;;  %v104_v54 = vpop.permute.xlu0 %103  ;;  %v67_v61 = vadd.f32 %v65_v59, %v33_v57  ;;  %vm999_vm8 = vmand %vm211_vm5, %vm213_vm6  ;;  %vm470_vm15 = vcmp.le.s32.totalorder %v986_v29, 208  ;;  %vm603_vm6 = vcmask 785408  }
  0x97   :  { %v98_v48 = vadd.f32 %v96_v46, %v57_v41  ;;  %v135_v49 = vpop.permute.xlu1 %134  ;;  %v105_v60 = vrot.slane %v104_v54, 2 }
  0x98   :  { %v136_v50 = vrot.slane %v135_v49, 2 }
  0x99   :  { %v106_v63 = vsel %vm85_vm1, %v104_v54, %v105_v60 }
  0x9a   :  { %v137_v51 = vsel %vm126_vm2, %v135_v49, %v136_v50  ;;  %82 = vrot.lane.b32.xlu1 %v80_v47, %s913_s25  ;;  %v145_v58 = vpop.permute.xlu0 %144  ;;  %v108_v4 = vadd.f32 %v106_v63, %v67_v61 }
  0x9b   :  { %v139_v52 = vadd.f32 %v137_v51, %v98_v48  ;;  %v146_v1 = vrot.slane %v145_v58, 2 }
  0x9d   :  { %v147_v5 = vsel %vm126_vm2, %v145_v58, %v146_v1 }
  0x9e   :  { %161 = vrot.lane.b32.xlu1 %v139_v52, %s914_s3  ;;  %v42_v62 = vpop.permute.xlu0 %41  ;;  %v149_v11 = vadd.f32 %v147_v5, %v108_v4  ;;  %s841_s3 = sld [smem:[#allocation2 + $0x24]] }
  0x9f   :  { %v43_v3 = vrot.slane %v42_v62, 2 }
  0xa1   :  { %v45_v10 = vsel %vm44_vm0, %v42_v62, %v43_v3 }
  0xa2   :  { %v124_v8 = vpop.permute.xlu0 %123  ;;  %v47_v15 = vadd.f32 %v45_v10, %v27_v7 }
  0xa3   :  { %v125_v13 = vrot.slane %v124_v8, 2 }
  0xa5   :  { %v127_v19 = vsel %vm126_vm2, %v124_v8, %v125_v13 }
 0x108   :  { %v170_v6 = vpop.permute.xlu1 %169 }
 0x109   :  { %v171_v9 = vrot.slane %v170_v6, 2 }
 0x10b   :  { %v172_v12 = vsel %vm164_vm3, %v170_v6, %v171_v9 }
 0x10c   :  { %v174_v14 = vadd.f32 %v172_v12, %v149_v11  ;;  %v83_v16 = vpop.permute.xlu1 %82 }
 0x10d   :  { %v84_v17 = vrot.slane %v83_v16, 2 }
 0x10e   :  { %176 = vrot.lane.b32.xlu0 %v174_v14, %s915_s6  ;;  %v279_v14 = vstv %s823_s9  ;;  %s849_s9 = sld [smem:[#allocation2 + $0x2c]] }
 0x10f   :  { %v86_v18 = vsel %vm85_vm1, %v83_v16, %v84_v17  ;;  %v282_v16 = vstv %s824_s10  ;;  %s852_s10 = sld [smem:[#allocation2 + $0x2f]] }
 0x110   :  { %v88_v0 = vadd.f32 %v86_v18, %v47_v15  ;;  %v162_v20 = vpop.permute.xlu1 %161 }
 0x111   :  { %v163_v21 = vrot.slane %v162_v20, 2 }
 0x112   :  { %v129_v22 = vadd.f32 %v127_v19, %v88_v0 }
 0x113   :  { %v165_v23 = vsel %vm164_vm3, %v162_v20, %v163_v21  ;;  %v372_v20 = vstv %s836_s11  ;;  %v331_v21 = vstv %s832_s12  ;;  %s853_s11 = sld [smem:[#allocation2 + $0x30]]  ;;  %s856_s12 = sld [smem:[#allocation2 + $0x33]] }
 0x114   :  { %v167_v24 = vadd.f32 %v165_v23, %v129_v22 }
 0x180   :  { %v177_v32 = vpop.permute.xlu0 %176 }
 0x181   :  { %v178_v34 = vrot.slane %v177_v32, 2 }
 0x183   :  { %v180_v37 = vsel %vm179_vm4, %v177_v32, %v178_v34  ;;  %v352_v32 = vstv %s834_s16  ;;  %s847_s16 = sld [smem:[#allocation2 + $0x2a]] }
 0x184   :  { %v182_v38 = vadd.f32 %v180_v37, %v167_v24  ;;  %v393_v37 = vstv %s838_s18  ;;  %s846_s18 = sld [smem:[#allocation2 + $0x29]] }
 0x186   :  { %v223_v40 = vrot.slane %v182_v38, %v990_v36 }
 0x188   :  { %v224_v42 = vcombine.high %v223_v40, %v223_v40  ;;  %v227_v43 = vsel %vm994_vm7, %v223_v40, 0.0  ;;  %v403_v40 = vstv %s839_s1  ;;  %s844_s1 = sld [smem:[#allocation2 + $0x27]] }
 0x189   :  { %v230_v45 = vsel %vm229_vm9, %v227_v43, 0.0 }
 0x18a   :  { %v228_v44 = vsel %vm999_vm8, %v224_v42, 0.0  ;;  %v301_v42 = vstv %s829_s21  ;;  %s845_s21 = sld [smem:[#allocation2 + $0x28]] }
 0x18b   :  { %v232_v46 = vsel %vm231_vm10, %v228_v44, 0.0  ;;  %v382_v44 = vstv %s837_s22  ;;  %s859_s22 = sld [smem:[#allocation2 + $0x37]] }
 0x18c   :  { %v233_v47 = vadd.f32 %v232_v46, %v230_v45  ;;  %v298_v46 = vstv %s828_s24  ;;  %s860_s24 = sld [smem:[#allocation2 + $0x38]] }
 0x18e   :  { %234 = vadd.xlane.f32.xlu1 %v233_v47 }
 0x21b   :  { %v235_v48 = vpop.xlane.xlu1 %234 }
 0x21c   :  { %v236_v49 = vrot.slane %v235_v48, 4 }
 0x21e   :  { %v237_v50 = vadd.f32 %v236_v49, %v235_v48 }
 0x220   :  { %v238_v51 = vrot.slane %v237_v50, 2 }
 0x222   :  { %v239_v52 = vadd.f32 %v238_v51, %v237_v50 }
 0x224   :  { %v240_v53 = vrot.slane %v239_v52, 1 }
 0x226   :  { %v241_v54 = vadd.f32 %v240_v53, %v239_v52 }
 0x228   :  { %861 = vpush %v241_v54 }
 0x259   :  { %s862_s7 = spop %861 }
 0x25a   :  { %v243_v55 = vstv %s862_s7  ;;  %s858_s7 = sld [smem:[#allocation2 + $0x35]] }
 0x25b   :  { %v245_v56 = vmul.f32 0.004132231, %v243_v55 }
 0x25d   :  { %v246_v57 = vsub.f32 %v182_v38, %v245_v56 }
 0x25f   :  { %v247_v58 = vmul.f32 %v246_v57, %v246_v57 }
 0x261   :  { %v255_v59 = vrot.slane %v247_v58, %v990_v36 }
 0x263   :  { %v256_v60 = vcombine.high %v255_v59, %v255_v59  ;;  %v259_v61 = vsel %vm994_vm7, %v255_v59, 0.0  ;;  %vm644_vm7 = vcmask 654336  }
 0x264   :  { %v261_v63 = vsel %vm229_vm9, %v259_v61, 0.0  ;;  %v292_v61 = vstv %s826_s0 }
 0x265   :  { %v260_v62 = vsel %vm999_vm8, %v256_v60, 0.0 }
 0x266   :  { %v262_v1 = vsel %vm231_vm10, %v260_v62, 0.0  ;;  %vm726_vm10 = vcmp.le.s32.totalorder %v986_v29, 144 }
 0x267   :  { %v263_v2 = vadd.f32 %v262_v1, %v261_v63 }
 0x269   :  { %264 = vadd.xlane.f32.xlu0 %v263_v2 }
 0x2f6   :  { %v265_v3 = vpop.xlane.xlu0 %264 }
 0x2f7   :  { %v266_v4 = vrot.slane %v265_v3, 4 }
 0x2f9   :  { %v267_v5 = vadd.f32 %v266_v4, %v265_v3 }
 0x2fb   :  { %v268_v6 = vrot.slane %v267_v5, 2 }
 0x2fd   :  { %v269_v7 = vadd.f32 %v268_v6, %v267_v5  ;;  %v341_v5 = vstv %s833_s26 }
 0x2ff   :  { %v270_v8 = vrot.slane %v269_v7, 1 }
 0x301   :  { %v271_v9 = vadd.f32 %v270_v8, %v269_v7  ;;  %v295_v7 = vstv %s827_s27 }
 0x303   :  { %863 = vpush %v271_v9 }
 0x334   :  { %s864_s8 = spop %863 }
 0x335   :  { %v273_v10 = vstv %s864_s8  ;;  %s848_s8 = sld [smem:[#allocation2 + $0x2b]] }
 0x336   :  { %v274_v11 = vmul.f32 0.004132231, %v273_v10 }
 0x338   :  { %v275_v12 = vadd.f32 1e-05, %v274_v11 }
 0x33a   :  { %884 = vrsqrt.f32 %v275_v12 }
 0x344   :  { %v885_v13 = vpop.eup %884 }
 0x345   :  { %v277_v15 = vmul.f32 %v885_v13, %v246_v57 }
 0x347   :  { %v280_v17 = vmul.f32 %v279_v14, %v277_v15 }
 0x349   :  { %v283_v18 = vadd.f32 %v282_v16, %v280_v17 }
 0x34b   :  { %886 = vtanh.f32 %v283_v18 }
 0x355   :  { %v887_v19 = vpop.eup %886 }
 0x356   :  { %vm285_vm11 = vcmp.lt.f32.partialorder %v887_v19, -1e-11  ;;  %v286_v0 = vmul.f32 -1e+10, %v887_v19 }
 0x358   :  { %v1016_v22 = vsel %vm285_vm11, %v286_v0, %v887_v19 }
 0x359   :  { %v373_v23 = vmul.f32 %v372_v20, %v1016_v22  ;;  %v332_v24 = vmul.f32 %v331_v21, %v1016_v22  ;;  %v414_v28 = vmul.f32 %v413_v25, %v1016_v22  ;;  %v312_v30 = vmul.f32 %v311_v27, %v1016_v22 }
 0x35a   :  { %v322_v33 = vmul.f32 %v321_v31, %v1016_v22  ;;  %v353_v34 = vmul.f32 %v352_v32, %v1016_v22  ;;  %v363_v38 = vmul.f32 %v362_v35, %v1016_v22  ;;  %v394_v39 = vmul.f32 %v393_v37, %v1016_v22 }
 0x35b   :  { %375 = vrot.lane.b32.xlu1 %v373_v23, %s917_s19  ;;  %334 = vrot.lane.b32.xlu0 %v332_v24, %s913_s25  ;;  %v404_v41 = vmul.f32 %v403_v40, %v1016_v22  ;;  %v302_v43 = vmul.f32 %v301_v42, %v1016_v22  ;;  %v383_v45 = vmul.f32 %v382_v44, %v1016_v22  ;;  %v289_v32 = vstv %s825_s28 }
 0x35c   :  { %v299_v51 = vmul.f32 %v298_v46, %v1016_v22  ;;  %v293_v6 = vmul.f32 %v292_v61, %v1016_v22  ;;  %v342_v12 = vmul.f32 %v341_v5, %v1016_v22  ;;  %v296_v16 = vmul.f32 %v295_v7, %v1016_v22 }
 0x35f   :  { %416 = vrot.lane.b32.xlu1 %v414_v28, %s918_s20  ;;  %314 = vrot.lane.b32.xlu0 %v312_v30, %s913_s25 }
 0x363   :  { %324 = vrot.lane.b32.xlu1 %v322_v33, %s913_s25  ;;  %355 = vrot.lane.b32.xlu0 %v353_v34, %s917_s19 }
 0x367   :  { %365 = vrot.lane.b32.xlu1 %v363_v38, %s917_s19  ;;  %396 = vrot.lane.b32.xlu0 %v394_v39, %s918_s20  ;;  %v290_v38 = vmul.f32 %v289_v32, %v1016_v22  ;;  %v454_v22 = vand.u32 3, %v986_v29 }
 0x369   :  { %vm468_vm14 = vcmp.eq.s32.totalorder %v454_v22, 0  ;;  %v608_v22 = vstv %s852_s10 }
 0x36a   :  { %vm1068_vm3 = vmand %vm468_vm14, %vm470_vm15 }
 0x36b   :  { %406 = vrot.lane.b32.xlu1 %v404_v41, %s918_s20 }
 0x36f   :  { %304 = vrot.lane.b32.xlu1 %v302_v43, %s913_s25 }
 0x373   :  { %385 = vrot.lane.b32.xlu1 %v383_v45, %s918_s20  ;;  %s851_s20 = sld [smem:[#allocation2 + $0x2e]] }
 0x3cd   :  { %v376_v47 = vpop.permute.xlu1 %375  ;;  %v335_v48 = vpop.permute.xlu0 %334 }
 0x3ce   :  { %v377_v49 = vrot.slane %v376_v47, 2  ;;  %v336_v50 = vrot.slane %v335_v48, 2 }
 0x3d0   :  { %v337_v52 = vsel %vm85_vm1, %v335_v48, %v336_v50  ;;  %v378_v56 = vsel %vm347_vm12, %v376_v47, %v377_v49 }
 0x3d1   :  { %v339_v53 = vadd.f32 %v337_v52, %v299_v51  ;;  %v417_v54 = vpop.permute.xlu1 %416  ;;  %v315_v55 = vpop.permute.xlu0 %314 }
 0x3d2   :  { %v418_v57 = vrot.slane %v417_v54, 2  ;;  %v316_v58 = vrot.slane %v315_v55, 2 }
 0x3d3   :  { %v380_v59 = vadd.f32 %v378_v56, %v339_v53  ;;  %v447_v53 = vand.u32 3, %v983_v26 }
 0x3d4   :  { %v419_v60 = vsel %vm388_vm13, %v417_v54, %v418_v57  ;;  %v317_v2 = vsel %vm85_vm1, %v315_v55, %v316_v58 }
 0x3d5   :  { %v421_v62 = vadd.f32 %v419_v60, %v380_v59  ;;  %v325_v63 = vpop.permute.xlu1 %324  ;;  %v356_v1 = vpop.permute.xlu0 %355  ;;  %v319_v9 = vadd.f32 %v317_v2, %v293_v6  ;;  %vm1063_vm2 = vcmp.eq.s32.totalorder %v447_v53, 0 }
 0x3d6   :  { %v326_v3 = vrot.slane %v325_v63, 2  ;;  %v357_v4 = vrot.slane %v356_v1, 2 }
 0x3d7   :  { %430 = vrot.lane.b32.xlu0 %v421_v62, %s915_s6 }
 0x3d8   :  { %v358_v8 = vsel %vm347_vm12, %v356_v1, %v357_v4  ;;  %v327_v13 = vsel %vm85_vm1, %v325_v63, %v326_v3 }
 0x3d9   :  { %v366_v10 = vpop.permute.xlu1 %365  ;;  %v397_v11 = vpop.permute.xlu0 %396  ;;  %v360_v17 = vadd.f32 %v358_v8, %v319_v9  ;;  %v329_v0 = vadd.f32 %v327_v13, %v296_v16 }
 0x3da   :  { %v367_v14 = vrot.slane %v366_v10, 2  ;;  %v398_v15 = vrot.slane %v397_v11, 2 }
 0x3db   :  { %344 = vrot.lane.b32.xlu0 %v342_v12, %s917_s19 }
 0x3dc   :  { %v368_v18 = vsel %vm347_vm12, %v366_v10, %v367_v14  ;;  %v399_v19 = vsel %vm388_vm13, %v397_v11, %v398_v15 }
 0x3dd   :  { %v401_v20 = vadd.f32 %v399_v19, %v360_v17  ;;  %v407_v21 = vpop.permute.xlu1 %406  ;;  %v370_v24 = vadd.f32 %v368_v18, %v329_v0 }
 0x3de   :  { %v408_v23 = vrot.slane %v407_v21, 2 }
 0x3df   :  { %423 = vrot.lane.b32.xlu0 %v401_v20, %s915_s6  ;;  %s850_s6 = sld [smem:[#allocation2 + $0x2d]] }
 0x3e0   :  { %v409_v25 = vsel %vm388_vm13, %v407_v21, %v408_v23 }
 0x3e1   :  { %v411_v27 = vadd.f32 %v409_v25, %v370_v24  ;;  %v305_v28 = vpop.permute.xlu1 %304 }
 0x3e2   :  { %v306_v30 = vrot.slane %v305_v28, 2 }
 0x3e4   :  { %v307_v35 = vsel %vm85_vm1, %v305_v28, %v306_v30 }
 0x3e5   :  { %v386_v34 = vpop.permute.xlu1 %385  ;;  %v309_v43 = vadd.f32 %v307_v35, %v290_v38 }
 0x3e6   :  { %v387_v41 = vrot.slane %v386_v34, 2 }
 0x3e8   :  { %v389_v46 = vsel %vm388_vm13, %v386_v34, %v387_v41  ;;  %v535_v34 = vstv %s841_s3 }
 0x449   :  { %v431_v31 = vpop.permute.xlu0 %430 }
 0x44a   :  { %v432_v33 = vrot.slane %v431_v31, 2 }
 0x44c   :  { %v433_v37 = vsel %vm179_vm4, %v431_v31, %v432_v33 }
 0x44d   :  { %v435_v39 = vadd.f32 %v433_v37, %v411_v27  ;;  %v345_v40 = vpop.permute.xlu0 %344  ;;  %v538_v37 = vstv %s842_s4 }
 0x44e   :  { %v346_v42 = vrot.slane %v345_v40, 2 }
 0x44f   :  { %437 = vrot.lane.b32.xlu1 %v435_v39, %s911_s23 }
 0x450   :  { %v348_v44 = vsel %vm347_vm12, %v345_v40, %v346_v42  ;;  %v628_v42 = vstv %s854_s5 }
 0x451   :  { %v350_v45 = vadd.f32 %v348_v44, %v309_v43  ;;  %v424_v48 = vpop.permute.xlu0 %423  ;;  %v587_v43 = vstv %s850_s6 }
 0x452   :  { %v425_v49 = vrot.slane %v424_v48, 2 }
 0x453   :  { %v391_v47 = vadd.f32 %v389_v46, %v350_v45 }
 0x454   :  { %v426_v50 = vsel %vm179_vm4, %v424_v48, %v425_v49  ;;  %vm487_vm4 = vcmask 672768   ;;  %v567_v48 = vstv %s848_s8 }
 0x455   :  { %v428_v54 = vadd.f32 %v426_v50, %v391_v47  ;;  %v669_v47 = vstv %s858_s7 }
 0x4c1   :  { %v438_v51 = vpop.permute.xlu1 %437 }
 0x4c2   :  { %v439_v52 = vrot.slane %v438_v51, 2 }
 0x4c4   :  { %v440_v55 = vsel %vm44_vm0, %v438_v51, %v439_v52  ;;  %v577_v51 = vstv %s849_s9 }
 0x4c5   :  { %v442_v56 = vadd.f32 %v440_v55, %v428_v54  ;;  %v618_v54 = vstv %s853_s11  ;;  %v649_v55 = vstv %s856_s12 }
 0x4c7   :  { %v480_v58 = vrot.slane %v442_v56, %v990_v36 }
 0x4c9   :  { %v481_v60 = vcombine.high %v480_v58, %v480_v58  ;;  %v484_v61 = vsel %vm1063_vm2, %v480_v58, 0.0  ;;  %v659_v58 = vstv %s857_s14 }
 0x4ca   :  { %v486_v63 = vsel %vm229_vm9, %v484_v61, 0.0 }
 0x4cb   :  { %v485_v62 = vsel %vm1068_vm3, %v481_v60, 0.0  ;;  %v557_v60 = vstv %s847_s16 }
 0x4cc   :  { %v488_v1 = vsel %vm487_vm4, %v485_v62, 0.0  ;;  %v638_v62 = vstv %s855_s17 }
 0x4cd   :  { %v489_v2 = vadd.f32 %v488_v1, %v486_v63  ;;  %v554_v1 = vstv %s846_s18 }
 0x4cf   :  { %490 = vadd.xlane.f32.xlu0 %v489_v2 }
 0x55c   :  { %v491_v3 = vpop.xlane.xlu0 %490 }
 0x55d   :  { %v492_v4 = vrot.slane %v491_v3, 4 }
 0x55f   :  { %v493_v5 = vadd.f32 %v492_v4, %v491_v3 }
 0x561   :  { %v494_v6 = vrot.slane %v493_v5, 2 }
 0x563   :  { %v495_v7 = vadd.f32 %v494_v6, %v493_v5 }
 0x565   :  { %v496_v8 = vrot.slane %v495_v7, 1 }
 0x567   :  { %v497_v9 = vadd.f32 %v496_v8, %v495_v7 }
 0x569   :  { %865 = vpush %v497_v9 }
 0x59a   :  { %s866_s29 = spop %865 }
 0x59b   :  { %v499_v10 = vstv %s866_s29 }
 0x59c   :  { %v501_v11 = vmul.f32 0.009433962, %v499_v10 }
 0x59e   :  { %v502_v12 = vsub.f32 %v442_v56, %v501_v11 }
 0x5a0   :  { %v503_v13 = vmul.f32 %v502_v12, %v502_v12 }
 0x5a2   :  { %v511_v14 = vrot.slane %v503_v13, %v990_v36 }
 0x5a4   :  { %v512_v15 = vcombine.high %v511_v14, %v511_v14  ;;  %v515_v16 = vsel %vm1063_vm2, %v511_v14, 0.0 }
 0x5a5   :  { %v517_v18 = vsel %vm229_vm9, %v515_v16, 0.0  ;;  %v548_v16 = vstv %s844_s1 }
 0x5a6   :  { %v516_v17 = vsel %vm1068_vm3, %v512_v15, 0.0 }
 0x5a7   :  { %v518_v19 = vsel %vm487_vm4, %v516_v17, 0.0 }
 0x5a8   :  { %v519_v0 = vadd.f32 %v518_v19, %v517_v18 }
 0x5aa   :  { %520 = vadd.xlane.f32.xlu1 %v519_v0 }
 0x637   :  { %v521_v20 = vpop.xlane.xlu1 %520 }
 0x638   :  { %v522_v21 = vrot.slane %v521_v20, 4 }
 0x63a   :  { %v523_v23 = vadd.f32 %v522_v21, %v521_v20 }
 0x63c   :  { %v524_v24 = vrot.slane %v523_v23, 2 }
 0x63e   :  { %v525_v25 = vadd.f32 %v524_v24, %v523_v23  ;;  %v597_v23 = vstv %s851_s20 }
 0x640   :  { %v526_v27 = vrot.slane %v525_v25, 1 }
 0x642   :  { %v527_v28 = vadd.f32 %v526_v27, %v525_v25  ;;  %v551_v25 = vstv %s845_s21 }
 0x644   :  { %867 = vpush %v527_v28 }
 0x675   :  { %s868_s30 = spop %867 }
 0x676   :  { %v529_v30 = vstv %s868_s30 }
 0x677   :  { %v530_v31 = vmul.f32 0.009433962, %v529_v30 }
 0x679   :  { %v531_v32 = vadd.f32 1e-05, %v530_v31 }
 0x67b   :  { %888 = vrsqrt.f32 %v531_v32 }
 0x685   :  { %v889_v33 = vpop.eup %888 }
 0x686   :  { %v533_v35 = vmul.f32 %v889_v33, %v502_v12 }
 0x688   :  { %v536_v38 = vmul.f32 %v535_v34, %v533_v35 }
 0x68a   :  { %v539_v39 = vadd.f32 %v538_v37, %v536_v38 }
 0x68c   :  { %890 = vtanh.f32 %v539_v39 }
 0x696   :  { %v891_v40 = vpop.eup %890 }
 0x697   :  { %vm541_vm5 = vcmp.lt.f32.partialorder %v891_v40, -1e-11  ;;  %v542_v41 = vmul.f32 -1e+10, %v891_v40 }
 0x699   :  { %v1085_v44 = vsel %vm541_vm5, %v542_v41, %v891_v40 }
 0x69a   :  { %v629_v45 = vmul.f32 %v628_v42, %v1085_v44  ;;  %v588_v46 = vmul.f32 %v587_v43, %v1085_v44  ;;  %v670_v49 = vmul.f32 %v669_v47, %v1085_v44  ;;  %v568_v50 = vmul.f32 %v567_v48, %v1085_v44 }
 0x69b   :  { %v578_v52 = vmul.f32 %v577_v51, %v1085_v44  ;;  %v609_v53 = vmul.f32 %v608_v22, %v1085_v44  ;;  %v619_v56 = vmul.f32 %v618_v54, %v1085_v44  ;;  %v650_v57 = vmul.f32 %v649_v55, %v1085_v44 }
 0x69c   :  { %631 = vrot.lane.b32.xlu1 %v629_v45, %s919_s13  ;;  %590 = vrot.lane.b32.xlu0 %v588_v46, %s917_s19  ;;  %v660_v59 = vmul.f32 %v659_v58, %v1085_v44  ;;  %v558_v61 = vmul.f32 %v557_v60, %v1085_v44  ;;  %v639_v63 = vmul.f32 %v638_v62, %v1085_v44 }
 0x69d   :  { %v555_v6 = vmul.f32 %v554_v1, %v1085_v44  ;;  %v549_v24 = vmul.f32 %v548_v16, %v1085_v44  ;;  %v598_v32 = vmul.f32 %v597_v23, %v1085_v44  ;;  %v552_v37 = vmul.f32 %v551_v25, %v1085_v44 }
 0x6a0   :  { %672 = vrot.lane.b32.xlu0 %v670_v49, %s920_s15  ;;  %570 = vrot.lane.b32.xlu1 %v568_v50, %s917_s19 }
 0x6a4   :  { %580 = vrot.lane.b32.xlu0 %v578_v52, %s917_s19  ;;  %611 = vrot.lane.b32.xlu1 %v609_v53, %s919_s13 }
 0x6a8   :  { %621 = vrot.lane.b32.xlu0 %v619_v56, %s919_s13  ;;  %652 = vrot.lane.b32.xlu1 %v650_v57, %s920_s15 }
 0x6ac   :  { %662 = vrot.lane.b32.xlu0 %v660_v59, %s920_s15 }
 0x6b0   :  { %560 = vrot.lane.b32.xlu0 %v558_v61, %s917_s19  ;;  %s843_s19 = sld [smem:[#allocation2 + $0x26]] }
 0x6b4   :  { %641 = vrot.lane.b32.xlu0 %v639_v63, %s920_s15 }
 0x6b6   :  { %v545_v22 = vstv %s843_s19 }
 0x6b7   :  { %v546_v56 = vmul.f32 %v545_v22, %v1085_v44  ;;  %v710_v44 = vand.u32 7, %v986_v29 }
 0x6b9   :  { %vm724_vm8 = vcmp.eq.s32.totalorder %v710_v44, 0 }
 0x70e   :  { %v632_v2 = vpop.permute.xlu1 %631  ;;  %v591_v3 = vpop.permute.xlu0 %590 }
 0x70f   :  { %v633_v4 = vrot.slane %v632_v2, 2  ;;  %v592_v5 = vrot.slane %v591_v3, 2 }
 0x711   :  { %v593_v7 = vsel %vm347_vm12, %v591_v3, %v592_v5  ;;  %v634_v11 = vsel %vm603_vm6, %v632_v2, %v633_v4 }
 0x712   :  { %v595_v8 = vadd.f32 %v593_v7, %v555_v6  ;;  %v673_v9 = vpop.permute.xlu0 %672  ;;  %v571_v10 = vpop.permute.xlu1 %570 }
 0x713   :  { %v674_v12 = vrot.slane %v673_v9, 2  ;;  %v572_v13 = vrot.slane %v571_v10, 2 }
 0x714   :  { %v636_v14 = vadd.f32 %v634_v11, %v595_v8  ;;  %v703_v8 = vand.u32 7, %v983_v26 }
 0x715   :  { %v675_v15 = vsel %vm644_vm7, %v673_v9, %v674_v12  ;;  %v573_v0 = vsel %vm347_vm12, %v571_v10, %v572_v13 }
 0x716   :  { %v677_v17 = vadd.f32 %v675_v15, %v636_v14  ;;  %v581_v18 = vpop.permute.xlu0 %580  ;;  %v612_v19 = vpop.permute.xlu1 %611  ;;  %v575_v28 = vadd.f32 %v573_v0, %v549_v24  ;;  %vm1132_vm11 = vcmp.eq.s32.totalorder %v703_v8, 0 }
 0x717   :  { %v582_v20 = vrot.slane %v581_v18, 2  ;;  %v613_v21 = vrot.slane %v612_v19, 2 }
 0x718   :  { %686 = vrot.lane.b32.xlu1 %v677_v17, %s911_s23 }
 0x719   :  { %v614_v27 = vsel %vm603_vm6, %v612_v19, %v613_v21  ;;  %v583_v33 = vsel %vm347_vm12, %v581_v18, %v582_v20 }
 0x71a   :  { %v622_v30 = vpop.permute.xlu0 %621  ;;  %v653_v31 = vpop.permute.xlu1 %652  ;;  %v616_v38 = vadd.f32 %v614_v27, %v575_v28  ;;  %v585_v41 = vadd.f32 %v583_v33, %v552_v37 }
 0x71b   :  { %v623_v34 = vrot.slane %v622_v30, 2  ;;  %v654_v35 = vrot.slane %v653_v31, 2 }
 0x71c   :  { %600 = vrot.lane.b32.xlu1 %v598_v32, %s919_s13 }
 0x71d   :  { %v624_v39 = vsel %vm603_vm6, %v622_v30, %v623_v34  ;;  %v655_v40 = vsel %vm644_vm7, %v653_v31, %v654_v35 }
 0x71e   :  { %v657_v42 = vadd.f32 %v655_v40, %v616_v38  ;;  %v663_v43 = vpop.permute.xlu0 %662  ;;  %v626_v46 = vadd.f32 %v624_v39, %v585_v41 }
 0x71f   :  { %v664_v45 = vrot.slane %v663_v43, 2 }
 0x720   :  { %679 = vrot.lane.b32.xlu1 %v657_v42, %s911_s23 }
 0x721   :  { %v665_v47 = vsel %vm644_vm7, %v663_v43, %v664_v45 }
 0x722   :  { %v667_v48 = vadd.f32 %v665_v47, %v626_v46  ;;  %v561_v49 = vpop.permute.xlu0 %560 }
 0x723   :  { %v562_v50 = vrot.slane %v561_v49, 2 }
 0x725   :  { %v563_v54 = vsel %vm347_vm12, %v561_v49, %v562_v50  ;;  %vm743_vm12 = vcmask 181248  }
 0x726   :  { %v642_v53 = vpop.permute.xlu0 %641  ;;  %v565_v61 = vadd.f32 %v563_v54, %v546_v56 }
 0x727   :  { %v643_v59 = vrot.slane %v642_v53, 2 }
 0x729   :  { %v645_v1 = vsel %vm644_vm7, %v642_v53, %v643_v59 }
 0x78a   :  { %v687_v51 = vpop.permute.xlu1 %686 }
 0x78b   :  { %v688_v52 = vrot.slane %v687_v51, 2 }
 0x78d   :  { %v689_v55 = vsel %vm44_vm0, %v687_v51, %v688_v52  ;;  %v791_v51 = vstv %s859_s22  ;;  %v794_v52 = vstv %s860_s24 }
 0x78e   :  { %v691_v57 = vadd.f32 %v689_v55, %v667_v48  ;;  %v601_v58 = vpop.permute.xlu1 %600 }
 0x78f   :  { %v602_v60 = vrot.slane %v601_v58, 2 }
 0x790   :  { %693 = vrot.lane.b32.xlu0 %v691_v57, %s913_s25 }
 0x791   :  { %v604_v62 = vsel %vm603_vm6, %v601_v58, %v602_v60 }
 0x792   :  { %v606_v63 = vadd.f32 %v604_v62, %v565_v61  ;;  %v680_v3 = vpop.permute.xlu1 %679 }
 0x793   :  { %v681_v4 = vrot.slane %v680_v3, 2 }
 0x794   :  { %v647_v2 = vadd.f32 %v645_v1, %v606_v63 }
 0x795   :  { %v682_v5 = vsel %vm44_vm0, %v680_v3, %v681_v4  ;;  %vm1137_vm0 = vmand %vm724_vm8, %vm726_vm10 }
 0x796   :  { %v684_v9 = vadd.f32 %v682_v5, %v647_v2 }
 0x802   :  { %v694_v6 = vpop.permute.xlu0 %693 }
 0x803   :  { %v695_v7 = vrot.slane %v694_v6, 2 }
 0x805   :  { %v696_v10 = vsel %vm85_vm1, %v694_v6, %v695_v7  ;;  %vm800_vm1 = vcmask 183298  }
 0x806   :  { %v698_v11 = vadd.f32 %v696_v10, %v684_v9  ;;  %vm801_vm13 = vmor %vm800_vm1, %vm229_vm9 }
 0x808   :  { %v736_v13 = vrot.slane %v698_v11, %v990_v36 }
 0x80a   :  { %v737_v15 = vcombine.high %v736_v13, %v736_v13  ;;  %v740_v26 = vsel %vm1132_vm11, %v736_v13, 0.0 }
 0x80b   :  { %v742_v29 = vsel %vm229_vm9, %v740_v26, 0.0 }
 0x80c   :  { %v741_v16 = vsel %vm1137_vm0, %v737_v15, 0.0 }
 0x80d   :  { %v744_v17 = vsel %vm743_vm12, %v741_v16, 0.0 }
 0x80e   :  { %v745_v18 = vadd.f32 %v744_v17, %v742_v29 }
 0x810   :  { %746 = vadd.xlane.f32.xlu1 %v745_v18 }
 0x89d   :  { %v747_v19 = vpop.xlane.xlu1 %746 }
 0x89e   :  { %v748_v0 = vrot.slane %v747_v19, 4 }
 0x8a0   :  { %v749_v20 = vadd.f32 %v748_v0, %v747_v19 }
 0x8a2   :  { %v750_v21 = vrot.slane %v749_v20, 2 }
 0x8a4   :  { %v751_v23 = vadd.f32 %v750_v21, %v749_v20 }
 0x8a6   :  { %v752_v24 = vrot.slane %v751_v23, 1 }
 0x8a8   :  { %v753_v25 = vadd.f32 %v752_v24, %v751_v23 }
 0x8aa   :  { %869 = vpush %v753_v25 }
 0x8db   :  { %s870_s23 = spop %869 }
 0x8dc   :  { %v755_v27 = vstv %s870_s23 }
 0x8dd   :  { %v757_v28 = vmul.f32 0.02631579, %v755_v27 }
 0x8df   :  { %v758_v30 = vsub.f32 %v698_v11, %v757_v28 }
 0x8e1   :  { %v759_v31 = vmul.f32 %v758_v30, %v758_v30 }
 0x8e3   :  { %v767_v32 = vrot.slane %v759_v31, %v990_v36 }
 0x8e5   :  { %v768_v33 = vcombine.high %v767_v32, %v767_v32  ;;  %v771_v34 = vsel %vm1132_vm11, %v767_v32, 0.0 }
 0x8e6   :  { %v773_v37 = vsel %vm229_vm9, %v771_v34, 0.0 }
 0x8e7   :  { %v772_v35 = vsel %vm1137_vm0, %v768_v33, 0.0 }
 0x8e8   :  { %v774_v38 = vsel %vm743_vm12, %v772_v35, 0.0 }
 0x8e9   :  { %v775_v39 = vadd.f32 %v774_v38, %v773_v37 }
 0x8eb   :  { %776 = vadd.xlane.f32.xlu0 %v775_v39 }
 0x978   :  { %v777_v40 = vpop.xlane.xlu0 %776 }
 0x979   :  { %v778_v41 = vrot.slane %v777_v40, 4 }
 0x97b   :  { %v779_v42 = vadd.f32 %v778_v41, %v777_v40 }
 0x97d   :  { %v780_v43 = vrot.slane %v779_v42, 2 }
 0x97f   :  { %v781_v45 = vadd.f32 %v780_v43, %v779_v42 }
 0x981   :  { %v782_v46 = vrot.slane %v781_v45, 1 }
 0x983   :  { %v783_v36 = vadd.f32 %v782_v46, %v781_v45 }
 0x985   :  { %871 = vpush %v783_v36 }
 0x9b6   :  { %s872_s25 = spop %871 }
 0x9b7   :  { %v785_v47 = vstv %s872_s25 }
 0x9b8   :  { %v786_v48 = vmul.f32 0.02631579, %v785_v47 }
 0x9ba   :  { %v787_v49 = vadd.f32 1e-05, %v786_v48 }
 0x9bc   :  { %892 = vrsqrt.f32 %v787_v49 }
 0x9c6   :  { %v893_v50 = vpop.eup %892 }
 0x9c7   :  { %v789_v22 = vmul.f32 %v893_v50, %v758_v30 }
 0x9c9   :  { %v792_v53 = vmul.f32 %v791_v51, %v789_v22 }
 0x9cb   :  { %v795_v54 = vadd.f32 %v794_v52, %v792_v53 }
 0x9cd   :  { %894 = vtanh.f32 %v795_v54 }
 0x9d7   :  { %v895_v55 = vpop.eup %894 }
 0x9d8   :  { %vm797_vm14 = vcmp.lt.f32.partialorder %v895_v55, -1e-11  ;;  %v798_v56 = vmul.f32 -1e+10, %v895_v55 }
 0x9da   :  { %v799_v57 = vsel %vm797_vm14, %v798_v56, %v895_v55 }
 0x9db   :  { %802 = vst.msk [vmem:[%s1160_s2] sm:$0xf] %vm801_vm13, %v799_v57 }
 0x9dc   :  { %807 = vsyncpa [#allocation3], 1 }

</bundles_post_ra>
